<compile_context>
chip_gen: v7x
topology: tpu7x:2x2x1
jax: 0.10.0
libtpu: 0.0.40
codegen_flags: <defaults>
</compile_context>

<pallas_src>
import jax
import jax.numpy as jnp
from jax.experimental import pallas as pl
from jax.experimental.pallas import tpu as pltpu


def _round_up(x, m):
    return (x + m - 1) // m * m


# ----------------------------------------------------------------------------
# Pass 1: conv (k=4, s=2, p=1, bias-free) + per-image BN partial statistics
# ----------------------------------------------------------------------------
def _make_conv_stats_kernel(ho, wo, cin):
    def kernel(s_ref, w_ref, y_ref, ssum_ref, ssq_ref, acc_ref):
        # s_ref   : (1, 4, ho+1, wo+1, cin) bf16  parity-split padded input
        # w_ref   : (16, cin, cout)         bf16  per-tap weight matrices
        # y_ref   : (1, ho*wo, cout)        f32   conv output (pre-BN)
        # ssum_ref: (1, 1, cout)            f32   per-image sum(x)
        # ssq_ref : (1, 1, cout)            f32   per-image sum(x*x)
        # acc_ref : (ho*wo, cout)           f32   VMEM accumulator
        acc_ref[...] = jnp.zeros_like(acc_ref)
        for i in range(4):                      # kernel tap rows
            ah = i // 2
            for j in range(4):                  # kernel tap cols
                aw = j // 2
                p = (i % 2) * 2 + (j % 2)       # parity slab index
                win = s_ref[0, p, pl.ds(ah, ho), pl.ds(aw, wo), :]
                a = win.reshape(ho * wo, cin)   # im2col column built in VMEM
                acc_ref[...] += jnp.dot(
                    a, w_ref[i * 4 + j], preferred_element_type=jnp.float32)
        y = acc_ref[...]
        y_ref[0] = y
        # Single-pass stats in the matmul epilogue (XLU work, off the VPU path).
        ssum_ref[...] = jnp.sum(y, axis=0, keepdims=True)[None]
        ssq_ref[...] = jnp.sum(y * y, axis=0, keepdims=True)[None]

    return kernel


# ----------------------------------------------------------------------------
# Pass 2: BN finalize (from partial sums) + affine + LeakyReLU(0.2), row-tiled
# ----------------------------------------------------------------------------
def _make_bn_lrelu_kernel(inv_n, eps):
    def kernel(y_ref, ssum_ref, ssq_ref, gamma_ref, beta_ref, o_ref):
        # y_ref: (TR, C) f32 tile; ssum/ssq: (B, 1, C) f32 (tiny, resident)
        s = jnp.sum(ssum_ref[...], axis=0)                  # (1, C)
        sq = jnp.sum(ssq_ref[...], axis=0)                  # (1, C)
        mean = s * inv_n
        var = jnp.maximum(sq * inv_n - mean * mean, 0.0)    # biased batch var
        scale = gamma_ref[...] * jax.lax.rsqrt(var + eps)
        shift = beta_ref[...] - mean * scale
        y = y_ref[...] * scale + shift
        o_ref[...] = jnp.where(y >= 0.0, y, 0.2 * y)        # LeakyReLU(0.2)

    return kernel


# ----------------------------------------------------------------------------
# Forward pass (matches dfcEncoderBlock.forward)
# ----------------------------------------------------------------------------
def dfc_encoder_block(x, w, gamma, beta, *, eps=1e-5):
    """x: (B, Cin, H, W) NCHW; w: (Cout, Cin, 4, 4); gamma/beta: (Cout,)."""
    B, cin, H, W = x.shape
    cout = w.shape[0]
    assert w.shape == (cout, cin, 4, 4)
    assert H % 2 == 0 and W % 2 == 0
    ho, wo = H // 2, W // 2
    hq, wq = ho + 1, wo + 1

    # NCHW -> NHWC, pad by 1, split into 2x2 parity slabs (space-to-depth):
    # one ~1x relayout copy instead of a 16x im2col materialization in HBM.
    xn = jnp.transpose(x, (0, 2, 3, 1)).astype(jnp.bfloat16)
    xp = jnp.pad(xn, ((0, 0), (1, 1), (1, 1), (0, 0)))
    s_par = (xp.reshape(B, hq, 2, wq, 2, cin)
               .transpose(0, 2, 4, 1, 3, 5)
               .reshape(B, 4, hq, wq, cin))
    # Weights (Cout, Cin, 4, 4) -> (16 taps, Cin, Cout); bf16 MXU operands.
    wt = jnp.transpose(w, (2, 3, 1, 0)).reshape(16, cin, cout).astype(jnp.bfloat16)

    y3, ssum, ssq = pl.pallas_call(
        _make_conv_stats_kernel(ho, wo, cin),
        out_shape=(jax.ShapeDtypeStruct((B, ho * wo, cout), jnp.float32),
                   jax.ShapeDtypeStruct((B, 1, cout), jnp.float32),
                   jax.ShapeDtypeStruct((B, 1, cout), jnp.float32)),
        grid=(B,),
        in_specs=[pl.BlockSpec((1, 4, hq, wq, cin), lambda b: (b, 0, 0, 0, 0)),
                  pl.BlockSpec((16, cin, cout), lambda b: (0, 0, 0))],
        out_specs=(pl.BlockSpec((1, ho * wo, cout), lambda b: (b, 0, 0)),
                   pl.BlockSpec((1, 1, cout), lambda b: (b, 0, 0)),
                   pl.BlockSpec((1, 1, cout), lambda b: (b, 0, 0))),
        scratch_shapes=[pltpu.VMEM((ho * wo, cout), jnp.float32)],
        compiler_params=pltpu.CompilerParams(dimension_semantics=("parallel",)),
    )(s_par, wt)

    # Row-tiled normalize + LeakyReLU over the flattened (B*Ho*Wo, Cout) slab.
    R = B * ho * wo
    y2d = y3.reshape(R, cout)
    tr = min(512, max(8, _round_up(pl.cdiv(R, 2), 8)))   # >=2 tiles, <=512 rows
    Rp = _round_up(R, tr)
    if Rp != R:
        y2d = jnp.pad(y2d, ((0, Rp - R), (0, 0)))

    out = pl.pallas_call(
        _make_bn_lrelu_kernel(1.0 / R, eps),
        out_shape=jax.ShapeDtypeStruct((Rp, cout), jnp.float32),
        grid=(Rp // tr,),
        in_specs=[pl.BlockSpec((tr, cout), lambda i: (i, 0)),
                  pl.BlockSpec((B, 1, cout), lambda i: (0, 0, 0)),
                  pl.BlockSpec((B, 1, cout), lambda i: (0, 0, 0)),
                  pl.BlockSpec((1, cout), lambda i: (0, 0)),
                  pl.BlockSpec((1, cout), lambda i: (0, 0))],
        out_specs=pl.BlockSpec((tr, cout), lambda i: (i, 0)),
        compiler_params=pltpu.CompilerParams(dimension_semantics=("parallel",)),
    )(y2d, ssum, ssq,
      gamma.reshape(1, cout).astype(jnp.float32),
      beta.reshape(1, cout).astype(jnp.float32))

    out = out[:R].reshape(B, ho, wo, cout)
    return jnp.transpose(out, (0, 3, 1, 2))   # back to NCHW


# ----------------------------------------------------------------------------
# Pure-JAX reference (f32) for a correctness sanity check
# ----------------------------------------------------------------------------
def _reference(x, w, gamma, beta, eps=1e-5):
    y = jax.lax.conv_general_dilated(
        x, w, window_strides=(2, 2), padding=((1, 1), (1, 1)),
        dimension_numbers=("NCHW", "OIHW", "NCHW"))
    mean = jnp.mean(y, axis=(0, 2, 3), keepdims=True)
    var = jnp.mean(jnp.square(y - mean), axis=(0, 2, 3), keepdims=True)
    yn = (y - mean) * jax.lax.rsqrt(var + eps)
    yn = yn * gamma[None, :, None, None] + beta[None, :, None, None]
    return jnp.where(yn >= 0.0, yn, 0.2 * yn)


if __name__ == "__main__":
    B, CIN, H, W = 2, 4, 16, 16
    COUT = 128   # lane-dense output channels for the demo

    key = jax.random.PRNGKey(0)
    kx, kw, kg = jax.random.split(key, 3)
    x = jax.random.normal(kx, (B, CIN, H, W), jnp.float32)
    w = 0.02 * jax.random.normal(kw, (COUT, CIN, 4, 4), jnp.float32)   # init_layers
    gamma = 1.0 + 0.02 * jax.random.normal(kg, (COUT,), jnp.float32)   # BN weight
    beta = jnp.zeros((COUT,), jnp.float32)                             # BN bias

    fwd = jax.jit(dfc_encoder_block)
    out = jax.block_until_ready(fwd(x, w, gamma, beta))

    assert out.shape == (B, COUT, H // 2, W // 2), out.shape
    assert bool(jnp.all(jnp.isfinite(out)))

    ref = _reference(x, w, gamma, beta)
    max_err = float(jnp.max(jnp.abs(out - ref)))
    assert max_err < 5e-2, f"max abs err {max_err}"   # bf16 MXU operands, f32 acc

    print("KERNEL_OK")
</pallas_src>

<mosaic_0001>
module attributes {stable_mosaic.version = 11 : i64} {
  func.func @kernel(%arg0: i32, %arg1: memref<64x128xf32, #tpu.memory_space<vmem>>, %arg2: memref<2x1x128xf32, #tpu.memory_space<vmem>>, %arg3: memref<2x1x128xf32, #tpu.memory_space<vmem>>, %arg4: memref<1x128xf32, #tpu.memory_space<vmem>>, %arg5: memref<1x128xf32, #tpu.memory_space<vmem>>, %arg6: memref<64x128xf32, #tpu.memory_space<vmem>>) attributes {dimension_semantics = [#tpu.dimension_semantics<parallel>], iteration_bounds = array<i64: 2>, scalar_prefetch = 0 : i64, scratch_operands = 0 : i64, tpu.core_type = #tpu.core_type<tc>, window_params = [{transform_indices = @transform_0, window_bounds = array<i64: 64, 128>}, {pipeline_mode = #tpu.pipeline_mode<synchronous>, transform_indices = @transform_1, window_bounds = array<i64: 2, 1, 128>}, {pipeline_mode = #tpu.pipeline_mode<synchronous>, transform_indices = @transform_2, window_bounds = array<i64: 2, 1, 128>}, {pipeline_mode = #tpu.pipeline_mode<synchronous>, transform_indices = @transform_3, window_bounds = array<i64: 1, 128>}, {pipeline_mode = #tpu.pipeline_mode<synchronous>, transform_indices = @transform_4, window_bounds = array<i64: 1, 128>}, {transform_indices = @transform_5, window_bounds = array<i64: 64, 128>}]} {
    %c0 = arith.constant 0 : index
    %c0_0 = arith.constant 0 : index
    %c0_1 = arith.constant 0 : index
    %0 = vector.load %arg2[%c0, %c0_0, %c0_1] : memref<2x1x128xf32, #tpu.memory_space<vmem>>, vector<2x1x128xf32>
    %cst = arith.constant dense<0.000000e+00> : vector<1x128xf32>
    %1 = vector.multi_reduction <add>, %0, %cst [0] : vector<2x1x128xf32> to vector<1x128xf32>
    %c0_2 = arith.constant 0 : index
    %c0_3 = arith.constant 0 : index
    %c0_4 = arith.constant 0 : index
    %2 = vector.load %arg3[%c0_2, %c0_3, %c0_4] : memref<2x1x128xf32, #tpu.memory_space<vmem>>, vector<2x1x128xf32>
    %cst_5 = arith.constant dense<0.000000e+00> : vector<1x128xf32>
    %3 = vector.multi_reduction <add>, %2, %cst_5 [0] : vector<2x1x128xf32> to vector<1x128xf32>
    %cst_6 = arith.constant 7.812500e-03 : f32
    %4 = vector.broadcast %cst_6 : f32 to vector<1x128xf32>
    %5 = arith.mulf %1, %4 : vector<1x128xf32>
    %cst_7 = arith.constant 7.812500e-03 : f32
    %6 = vector.broadcast %cst_7 : f32 to vector<1x128xf32>
    %7 = arith.mulf %3, %6 : vector<1x128xf32>
    %8 = arith.mulf %5, %5 : vector<1x128xf32>
    %9 = arith.subf %7, %8 : vector<1x128xf32>
    %cst_8 = arith.constant 0.000000e+00 : f32
    %10 = vector.broadcast %cst_8 : f32 to vector<1x128xf32>
    %11 = arith.maximumf %9, %10 : vector<1x128xf32>
    %c0_9 = arith.constant 0 : index
    %c0_10 = arith.constant 0 : index
    %12 = vector.load %arg4[%c0_9, %c0_10] : memref<1x128xf32, #tpu.memory_space<vmem>>, vector<1x128xf32>
    %cst_11 = arith.constant 9.99999974E-6 : f32
    %13 = vector.broadcast %cst_11 : f32 to vector<1x128xf32>
    %14 = arith.addf %11, %13 : vector<1x128xf32>
    %15 = math.rsqrt %14 : vector<1x128xf32>
    %16 = arith.mulf %12, %15 : vector<1x128xf32>
    %c0_12 = arith.constant 0 : index
    %c0_13 = arith.constant 0 : index
    %17 = vector.load %arg5[%c0_12, %c0_13] : memref<1x128xf32, #tpu.memory_space<vmem>>, vector<1x128xf32>
    %18 = arith.mulf %5, %16 : vector<1x128xf32>
    %19 = arith.subf %17, %18 : vector<1x128xf32>
    %c0_14 = arith.constant 0 : index
    %c0_15 = arith.constant 0 : index
    %20 = vector.load %arg1[%c0_14, %c0_15] : memref<64x128xf32, #tpu.memory_space<vmem>>, vector<64x128xf32>
    %21 = vector.broadcast %16 : vector<1x128xf32> to vector<64x128xf32>
    %22 = arith.mulf %20, %21 : vector<64x128xf32>
    %23 = vector.broadcast %19 : vector<1x128xf32> to vector<64x128xf32>
    %24 = arith.addf %22, %23 : vector<64x128xf32>
    %cst_16 = arith.constant 0.000000e+00 : f32
    %25 = vector.broadcast %cst_16 : f32 to vector<64x128xf32>
    %26 = arith.cmpf oge, %24, %25 : vector<64x128xf32>
    %cst_17 = arith.constant 2.000000e-01 : f32
    %27 = vector.broadcast %cst_17 : f32 to vector<64x128xf32>
    %28 = arith.mulf %27, %24 : vector<64x128xf32>
    %29 = arith.select %26, %24, %28 : vector<64x128xi1>, vector<64x128xf32>
    %c0_18 = arith.constant 0 : index
    %c0_19 = arith.constant 0 : index
    %30 = vector.load %arg6[%c0_18, %c0_19] : memref<64x128xf32, #tpu.memory_space<vmem>>, vector<64x128xf32>
    tpu.vector_store %arg6[%c0_18, %c0_19], %29 {strides = array<i32>} : memref<64x128xf32, #tpu.memory_space<vmem>>, vector<64x128xf32>,
    return
  }
  func.func @transform_0(%arg0: i32) -> (i32, i32) {
    %c0_i32 = arith.constant 0 : i32
    %c0_i32_0 = arith.constant 0 : i32
    return %arg0, %c0_i32 : i32, i32
  }
  func.func @transform_1(%arg0: i32) -> (i32, i32, i32) {
    %c0_i32 = arith.constant 0 : i32
    %c0_i32_0 = arith.constant 0 : i32
    %c0_i32_1 = arith.constant 0 : i32
    %c0_i32_2 = arith.constant 0 : i32
    return %c0_i32, %c0_i32_0, %c0_i32_1 : i32, i32, i32
  }
  func.func @transform_2(%arg0: i32) -> (i32, i32, i32) {
    %c0_i32 = arith.constant 0 : i32
    %c0_i32_0 = arith.constant 0 : i32
    %c0_i32_1 = arith.constant 0 : i32
    %c0_i32_2 = arith.constant 0 : i32
    return %c0_i32, %c0_i32_0, %c0_i32_1 : i32, i32, i32
  }
  func.func @transform_3(%arg0: i32) -> (i32, i32) {
    %c0_i32 = arith.constant 0 : i32
    %c0_i32_0 = arith.constant 0 : i32
    %c0_i32_1 = arith.constant 0 : i32
    return %c0_i32, %c0_i32_0 : i32, i32
  }
  func.func @transform_4(%arg0: i32) -> (i32, i32) {
    %c0_i32 = arith.constant 0 : i32
    %c0_i32_0 = arith.constant 0 : i32
    %c0_i32_1 = arith.constant 0 : i32
    return %c0_i32, %c0_i32_0 : i32, i32
  }
  func.func @transform_5(%arg0: i32) -> (i32, i32) {
    %c0_i32 = arith.constant 0 : i32
    %c0_i32_0 = arith.constant 0 : i32
    return %arg0, %c0_i32 : i32, i32
  }
}

module attributes {stable_mosaic.version = 11 : i64} {
  func.func @kernel(%arg0: i32, %arg1: memref<1x4x9x9x4xbf16, #tpu.memory_space<vmem>>, %arg2: memref<16x4x128xbf16, #tpu.memory_space<vmem>>, %arg3: memref<1x64x128xf32, #tpu.memory_space<vmem>>, %arg4: memref<1x1x128xf32, #tpu.memory_space<vmem>>, %arg5: memref<1x1x128xf32, #tpu.memory_space<vmem>>, %arg6: memref<64x128xf32, #tpu.memory_space<vmem>>) attributes {dimension_semantics = [#tpu.dimension_semantics<parallel>], iteration_bounds = array<i64: 2>, scalar_prefetch = 0 : i64, scratch_operands = 1 : i64, tpu.core_type = #tpu.core_type<tc>, window_params = [{transform_indices = @transform_0, window_bounds = array<i64: 1, 4, 9, 9, 4>}, {pipeline_mode = #tpu.pipeline_mode<synchronous>, transform_indices = @transform_1, window_bounds = array<i64: 16, 4, 128>}, {transform_indices = @transform_2, window_bounds = array<i64: 1, 64, 128>}, {transform_indices = @transform_3, window_bounds = array<i64: 1, 1, 128>}, {transform_indices = @transform_4, window_bounds = array<i64: 1, 1, 128>}]} {
    %cst = arith.constant 0.000000e+00 : f32
    %0 = vector.broadcast %cst : f32 to vector<64x128xf32>
    %c0 = arith.constant 0 : index
    %c0_0 = arith.constant 0 : index
    %1 = vector.load %arg6[%c0, %c0_0] : memref<64x128xf32, #tpu.memory_space<vmem>>, vector<64x128xf32>
    tpu.vector_store %arg6[%c0, %c0_0], %0 {strides = array<i32>} : memref<64x128xf32, #tpu.memory_space<vmem>>, vector<64x128xf32>,
    %c0_1 = arith.constant 0 : index
    %c0_2 = arith.constant 0 : index
    %c0_3 = arith.constant 0 : index
    %c0_4 = arith.constant 0 : index
    %c0_5 = arith.constant 0 : index
    %2 = vector.load %arg1[%c0_1, %c0_2, %c0_3, %c0_4, %c0_5] : memref<1x4x9x9x4xbf16, #tpu.memory_space<vmem>>, vector<1x1x8x8x4xbf16>
    %3 = vector.shape_cast %2 : vector<1x1x8x8x4xbf16> to vector<8x8x4xbf16>
    %4 = vector.shape_cast %3 : vector<8x8x4xbf16> to vector<64x4xbf16>
    %c0_6 = arith.constant 0 : index
    %c0_7 = arith.constant 0 : index
    %5 = vector.load %arg6[%c0_6, %c0_7] : memref<64x128xf32, #tpu.memory_space<vmem>>, vector<64x128xf32>
    %c0_8 = arith.constant 0 : index
    %c0_9 = arith.constant 0 : index
    %c0_10 = arith.constant 0 : index
    %6 = vector.load %arg2[%c0_8, %c0_9, %c0_10] : memref<16x4x128xbf16, #tpu.memory_space<vmem>>, vector<1x4x128xbf16>
    %7 = vector.shape_cast %6 : vector<1x4x128xbf16> to vector<4x128xbf16>
    %cst_11 = arith.constant dense<0.000000e+00> : vector<64x128xf32>
    %8 = tpu.matmul %4, %7, %cst_11 {dimension_numbers = #tpu.dot_dimension_numbers<[1], [0], [0], [1], [0, 0, 1, 1], [], []>} : vector<64x4xbf16>, vector<4x128xbf16>, vector<64x128xf32> -> vector<64x128xf32>
    %9 = arith.addf %5, %8 : vector<64x128xf32>
    %c0_12 = arith.constant 0 : index
    %c0_13 = arith.constant 0 : index
    %10 = vector.load %arg6[%c0_12, %c0_13] : memref<64x128xf32, #tpu.memory_space<vmem>>, vector<64x128xf32>
    tpu.vector_store %arg6[%c0_12, %c0_13], %9 {strides = array<i32>} : memref<64x128xf32, #tpu.memory_space<vmem>>, vector<64x128xf32>,
    %c0_14 = arith.constant 0 : index
    %c1 = arith.constant 1 : index
    %c0_15 = arith.constant 0 : index
    %c0_16 = arith.constant 0 : index
    %c0_17 = arith.constant 0 : index
    %11 = vector.load %arg1[%c0_14, %c1, %c0_15, %c0_16, %c0_17] : memref<1x4x9x9x4xbf16, #tpu.memory_space<vmem>>, vector<1x1x8x8x4xbf16>
    %12 = vector.shape_cast %11 : vector<1x1x8x8x4xbf16> to vector<8x8x4xbf16>
    %13 = vector.shape_cast %12 : vector<8x8x4xbf16> to vector<64x4xbf16>
    %c0_18 = arith.constant 0 : index
    %c0_19 = arith.constant 0 : index
    %14 = vector.load %arg6[%c0_18, %c0_19] : memref<64x128xf32, #tpu.memory_space<vmem>>, vector<64x128xf32>
    %c1_20 = arith.constant 1 : index
    %c0_21 = arith.constant 0 : index
    %c0_22 = arith.constant 0 : index
    %15 = vector.load %arg2[%c1_20, %c0_21, %c0_22] : memref<16x4x128xbf16, #tpu.memory_space<vmem>>, vector<1x4x128xbf16>
    %16 = vector.shape_cast %15 : vector<1x4x128xbf16> to vector<4x128xbf16>
    %cst_23 = arith.constant dense<0.000000e+00> : vector<64x128xf32>
    %17 = tpu.matmul %13, %16, %cst_23 {dimension_numbers = #tpu.dot_dimension_numbers<[1], [0], [0], [1], [0, 0, 1, 1], [], []>} : vector<64x4xbf16>, vector<4x128xbf16>, vector<64x128xf32> -> vector<64x128xf32>
    %18 = arith.addf %14, %17 : vector<64x128xf32>
    %c0_24 = arith.constant 0 : index
    %c0_25 = arith.constant 0 : index
    %19 = vector.load %arg6[%c0_24, %c0_25] : memref<64x128xf32, #tpu.memory_space<vmem>>, vector<64x128xf32>
    tpu.vector_store %arg6[%c0_24, %c0_25], %18 {strides = array<i32>} : memref<64x128xf32, #tpu.memory_space<vmem>>, vector<64x128xf32>,
    %c0_26 = arith.constant 0 : index
    %c0_27 = arith.constant 0 : index
    %c0_28 = arith.constant 0 : index
    %c1_29 = arith.constant 1 : index
    %c0_30 = arith.constant 0 : index
    %20 = vector.load %arg1[%c0_26, %c0_27, %c0_28, %c1_29, %c0_30] : memref<1x4x9x9x4xbf16, #tpu.memory_space<vmem>>, vector<1x1x8x8x4xbf16>
    %21 = vector.shape_cast %20 : vector<1x1x8x8x4xbf16> to vector<8x8x4xbf16>
    %22 = vector.shape_cast %21 : vector<8x8x4xbf16> to vector<64x4xbf16>
    %c0_31 = arith.constant 0 : index
    %c0_32 = arith.constant 0 : index
    %23 = vector.load %arg6[%c0_31, %c0_32] : memref<64x128xf32, #tpu.memory_space<vmem>>, vector<64x128xf32>
    %c2 = arith.constant 2 : index
    %c0_33 = arith.constant 0 : index
    %c0_34 = arith.constant 0 : index
    %24 = vector.load %arg2[%c2, %c0_33, %c0_34] : memref<16x4x128xbf16, #tpu.memory_space<vmem>>, vector<1x4x128xbf16>
    %25 = vector.shape_cast %24 : vector<1x4x128xbf16> to vector<4x128xbf16>
    %cst_35 = arith.constant dense<0.000000e+00> : vector<64x128xf32>
    %26 = tpu.matmul %22, %25, %cst_35 {dimension_numbers = #tpu.dot_dimension_numbers<[1], [0], [0], [1], [0, 0, 1, 1], [], []>} : vector<64x4xbf16>, vector<4x128xbf16>, vector<64x128xf32> -> vector<64x128xf32>
    %27 = arith.addf %23, %26 : vector<64x128xf32>
    %c0_36 = arith.constant 0 : index
    %c0_37 = arith.constant 0 : index
    %28 = vector.load %arg6[%c0_36, %c0_37] : memref<64x128xf32, #tpu.memory_space<vmem>>, vector<64x128xf32>
    tpu.vector_store %arg6[%c0_36, %c0_37], %27 {strides = array<i32>} : memref<64x128xf32, #tpu.memory_space<vmem>>, vector<64x128xf32>,
    %c0_38 = arith.constant 0 : index
    %c1_39 = arith.constant 1 : index
    %c0_40 = arith.constant 0 : index
    %c1_41 = arith.constant 1 : index
    %c0_42 = arith.constant 0 : index
    %29 = vector.load %arg1[%c0_38, %c1_39, %c0_40, %c1_41, %c0_42] : memref<1x4x9x9x4xbf16, #tpu.memory_space<vmem>>, vector<1x1x8x8x4xbf16>
    %30 = vector.shape_cast %29 : vector<1x1x8x8x4xbf16> to vector<8x8x4xbf16>
    %31 = vector.shape_cast %30 : vector<8x8x4xbf16> to vector<64x4xbf16>
    %c0_43 = arith.constant 0 : index
    %c0_44 = arith.constant 0 : index
    %32 = vector.load %arg6[%c0_43, %c0_44] : memref<64x128xf32, #tpu.memory_space<vmem>>, vector<64x128xf32>
    %c3 = arith.constant 3 : index
    %c0_45 = arith.constant 0 : index
    %c0_46 = arith.constant 0 : index
    %33 = vector.load %arg2[%c3, %c0_45, %c0_46] : memref<16x4x128xbf16, #tpu.memory_space<vmem>>, vector<1x4x128xbf16>
    %34 = vector.shape_cast %33 : vector<1x4x128xbf16> to vector<4x128xbf16>
    %cst_47 = arith.constant dense<0.000000e+00> : vector<64x128xf32>
    %35 = tpu.matmul %31, %34, %cst_47 {dimension_numbers = #tpu.dot_dimension_numbers<[1], [0], [0], [1], [0, 0, 1, 1], [], []>} : vector<64x4xbf16>, vector<4x128xbf16>, vector<64x128xf32> -> vector<64x128xf32>
    %36 = arith.addf %32, %35 : vector<64x128xf32>
    %c0_48 = arith.constant 0 : index
    %c0_49 = arith.constant 0 : index
    %37 = vector.load %arg6[%c0_48, %c0_49] : memref<64x128xf32, #tpu.memory_space<vmem>>, vector<64x128xf32>
    tpu.vector_store %arg6[%c0_48, %c0_49], %36 {strides = array<i32>} : memref<64x128xf32, #tpu.memory_space<vmem>>, vector<64x128xf32>,
    %c0_50 = arith.constant 0 : index
    %c2_51 = arith.constant 2 : index
    %c0_52 = arith.constant 0 : index
    %c0_53 = arith.constant 0 : index
    %c0_54 = arith.constant 0 : index
    %38 = vector.load %arg1[%c0_50, %c2_51, %c0_52, %c0_53, %c0_54] : memref<1x4x9x9x4xbf16, #tpu.memory_space<vmem>>, vector<1x1x8x8x4xbf16>
    %39 = vector.shape_cast %38 : vector<1x1x8x8x4xbf16> to vector<8x8x4xbf16>
    %40 = vector.shape_cast %39 : vector<8x8x4xbf16> to vector<64x4xbf16>
    %c0_55 = arith.constant 0 : index
    %c0_56 = arith.constant 0 : index
    %41 = vector.load %arg6[%c0_55, %c0_56] : memref<64x128xf32, #tpu.memory_space<vmem>>, vector<64x128xf32>
    %c4 = arith.constant 4 : index
    %c0_57 = arith.constant 0 : index
    %c0_58 = arith.constant 0 : index
    %42 = vector.load %arg2[%c4, %c0_57, %c0_58] : memref<16x4x128xbf16, #tpu.memory_space<vmem>>, vector<1x4x128xbf16>
    %43 = vector.shape_cast %42 : vector<1x4x128xbf16> to vector<4x128xbf16>
    %cst_59 = arith.constant dense<0.000000e+00> : vector<64x128xf32>
    %44 = tpu.matmul %40, %43, %cst_59 {dimension_numbers = #tpu.dot_dimension_numbers<[1], [0], [0], [1], [0, 0, 1, 1], [], []>} : vector<64x4xbf16>, vector<4x128xbf16>, vector<64x128xf32> -> vector<64x128xf32>
    %45 = arith.addf %41, %44 : vector<64x128xf32>
    %c0_60 = arith.constant 0 : index
    %c0_61 = arith.constant 0 : index
    %46 = vector.load %arg6[%c0_60, %c0_61] : memref<64x128xf32, #tpu.memory_space<vmem>>, vector<64x128xf32>
    tpu.vector_store %arg6[%c0_60, %c0_61], %45 {strides = array<i32>} : memref<64x128xf32, #tpu.memory_space<vmem>>, vector<64x128xf32>,
    %c0_62 = arith.constant 0 : index
    %c3_63 = arith.constant 3 : index
    %c0_64 = arith.constant 0 : index
    %c0_65 = arith.constant 0 : index
    %c0_66 = arith.constant 0 : index
    %47 = vector.load %arg1[%c0_62, %c3_63, %c0_64, %c0_65, %c0_66] : memref<1x4x9x9x4xbf16, #tpu.memory_space<vmem>>, vector<1x1x8x8x4xbf16>
    %48 = vector.shape_cast %47 : vector<1x1x8x8x4xbf16> to vector<8x8x4xbf16>
    %49 = vector.shape_cast %48 : vector<8x8x4xbf16> to vector<64x4xbf16>
    %c0_67 = arith.constant 0 : index
    %c0_68 = arith.constant 0 : index
    %50 = vector.load %arg6[%c0_67, %c0_68] : memref<64x128xf32, #tpu.memory_space<vmem>>, vector<64x128xf32>
    %c5 = arith.constant 5 : index
    %c0_69 = arith.constant 0 : index
    %c0_70 = arith.constant 0 : index
    %51 = vector.load %arg2[%c5, %c0_69, %c0_70] : memref<16x4x128xbf16, #tpu.memory_space<vmem>>, vector<1x4x128xbf16>
    %52 = vector.shape_cast %51 : vector<1x4x128xbf16> to vector<4x128xbf16>
    %cst_71 = arith.constant dense<0.000000e+00> : vector<64x128xf32>
    %53 = tpu.matmul %49, %52, %cst_71 {dimension_numbers = #tpu.dot_dimension_numbers<[1], [0], [0], [1], [0, 0, 1, 1], [], []>} : vector<64x4xbf16>, vector<4x128xbf16>, vector<64x128xf32> -> vector<64x128xf32>
    %54 = arith.addf %50, %53 : vector<64x128xf32>
    %c0_72 = arith.constant 0 : index
    %c0_73 = arith.constant 0 : index
    %55 = vector.load %arg6[%c0_72, %c0_73] : memref<64x128xf32, #tpu.memory_space<vmem>>, vector<64x128xf32>
    tpu.vector_store %arg6[%c0_72, %c0_73], %54 {strides = array<i32>} : memref<64x128xf32, #tpu.memory_space<vmem>>, vector<64x128xf32>,
    %c0_74 = arith.constant 0 : index
    %c2_75 = arith.constant 2 : index
    %c0_76 = arith.constant 0 : index
    %c1_77 = arith.constant 1 : index
    %c0_78 = arith.constant 0 : index
    %56 = vector.load %arg1[%c0_74, %c2_75, %c0_76, %c1_77, %c0_78] : memref<1x4x9x9x4xbf16, #tpu.memory_space<vmem>>, vector<1x1x8x8x4xbf16>
    %57 = vector.shape_cast %56 : vector<1x1x8x8x4xbf16> to vector<8x8x4xbf16>
    %58 = vector.shape_cast %57 : vector<8x8x4xbf16> to vector<64x4xbf16>
    %c0_79 = arith.constant 0 : index
    %c0_80 = arith.constant 0 : index
    %59 = vector.load %arg6[%c0_79, %c0_80] : memref<64x128xf32, #tpu.memory_space<vmem>>, vector<64x128xf32>
    %c6 = arith.constant 6 : index
    %c0_81 = arith.constant 0 : index
    %c0_82 = arith.constant 0 : index
    %60 = vector.load %arg2[%c6, %c0_81, %c0_82] : memref<16x4x128xbf16, #tpu.memory_space<vmem>>, vector<1x4x128xbf16>
    %61 = vector.shape_cast %60 : vector<1x4x128xbf16> to vector<4x128xbf16>
    %cst_83 = arith.constant dense<0.000000e+00> : vector<64x128xf32>
    %62 = tpu.matmul %58, %61, %cst_83 {dimension_numbers = #tpu.dot_dimension_numbers<[1], [0], [0], [1], [0, 0, 1, 1], [], []>} : vector<64x4xbf16>, vector<4x128xbf16>, vector<64x128xf32> -> vector<64x128xf32>
    %63 = arith.addf %59, %62 : vector<64x128xf32>
    %c0_84 = arith.constant 0 : index
    %c0_85 = arith.constant 0 : index
    %64 = vector.load %arg6[%c0_84, %c0_85] : memref<64x128xf32, #tpu.memory_space<vmem>>, vector<64x128xf32>
    tpu.vector_store %arg6[%c0_84, %c0_85], %63 {strides = array<i32>} : memref<64x128xf32, #tpu.memory_space<vmem>>, vector<64x128xf32>,
    %c0_86 = arith.constant 0 : index
    %c3_87 = arith.constant 3 : index
    %c0_88 = arith.constant 0 : index
    %c1_89 = arith.constant 1 : index
    %c0_90 = arith.constant 0 : index
    %65 = vector.load %arg1[%c0_86, %c3_87, %c0_88, %c1_89, %c0_90] : memref<1x4x9x9x4xbf16, #tpu.memory_space<vmem>>, vector<1x1x8x8x4xbf16>
    %66 = vector.shape_cast %65 : vector<1x1x8x8x4xbf16> to vector<8x8x4xbf16>
    %67 = vector.shape_cast %66 : vector<8x8x4xbf16> to vector<64x4xbf16>
    %c0_91 = arith.constant 0 : index
    %c0_92 = arith.constant 0 : index
    %68 = vector.load %arg6[%c0_91, %c0_92] : memref<64x128xf32, #tpu.memory_space<vmem>>, vector<64x128xf32>
    %c7 = arith.constant 7 : index
    %c0_93 = arith.constant 0 : index
    %c0_94 = arith.constant 0 : index
    %69 = vector.load %arg2[%c7, %c0_93, %c0_94] : memref<16x4x128xbf16, #tpu.memory_space<vmem>>, vector<1x4x128xbf16>
    %70 = vector.shape_cast %69 : vector<1x4x128xbf16> to vector<4x128xbf16>
    %cst_95 = arith.constant dense<0.000000e+00> : vector<64x128xf32>
    %71 = tpu.matmul %67, %70, %cst_95 {dimension_numbers = #tpu.dot_dimension_numbers<[1], [0], [0], [1], [0, 0, 1, 1], [], []>} : vector<64x4xbf16>, vector<4x128xbf16>, vector<64x128xf32> -> vector<64x128xf32>
    %72 = arith.addf %68, %71 : vector<64x128xf32>
    %c0_96 = arith.constant 0 : index
    %c0_97 = arith.constant 0 : index
    %73 = vector.load %arg6[%c0_96, %c0_97] : memref<64x128xf32, #tpu.memory_space<vmem>>, vector<64x128xf32>
    tpu.vector_store %arg6[%c0_96, %c0_97], %72 {strides = array<i32>} : memref<64x128xf32, #tpu.memory_space<vmem>>, vector<64x128xf32>,
    %c0_98 = arith.constant 0 : index
    %c0_99 = arith.constant 0 : index
    %c1_100 = arith.constant 1 : index
    %c0_101 = arith.constant 0 : index
    %c0_102 = arith.constant 0 : index
    %74 = vector.load %arg1[%c0_98, %c0_99, %c1_100, %c0_101, %c0_102] : memref<1x4x9x9x4xbf16, #tpu.memory_space<vmem>>, vector<1x1x8x8x4xbf16>
    %75 = vector.shape_cast %74 : vector<1x1x8x8x4xbf16> to vector<8x8x4xbf16>
    %76 = vector.shape_cast %75 : vector<8x8x4xbf16> to vector<64x4xbf16>
    %c0_103 = arith.constant 0 : index
    %c0_104 = arith.constant 0 : index
    %77 = vector.load %arg6[%c0_103, %c0_104] : memref<64x128xf32, #tpu.memory_space<vmem>>, vector<64x128xf32>
    %c8 = arith.constant 8 : index
    %c0_105 = arith.constant 0 : index
    %c0_106 = arith.constant 0 : index
    %78 = vector.load %arg2[%c8, %c0_105, %c0_106] : memref<16x4x128xbf16, #tpu.memory_space<vmem>>, vector<1x4x128xbf16>
    %79 = vector.shape_cast %78 : vector<1x4x128xbf16> to vector<4x128xbf16>
    %cst_107 = arith.constant dense<0.000000e+00> : vector<64x128xf32>
    %80 = tpu.matmul %76, %79, %cst_107 {dimension_numbers = #tpu.dot_dimension_numbers<[1], [0], [0], [1], [0, 0, 1, 1], [], []>} : vector<64x4xbf16>, vector<4x128xbf16>, vector<64x128xf32> -> vector<64x128xf32>
    %81 = arith.addf %77, %80 : vector<64x128xf32>
    %c0_108 = arith.constant 0 : index
    %c0_109 = arith.constant 0 : index
    %82 = vector.load %arg6[%c0_108, %c0_109] : memref<64x128xf32, #tpu.memory_space<vmem>>, vector<64x128xf32>
    tpu.vector_store %arg6[%c0_108, %c0_109], %81 {strides = array<i32>} : memref<64x128xf32, #tpu.memory_space<vmem>>, vector<64x128xf32>,
    %c0_110 = arith.constant 0 : index
    %c1_111 = arith.constant 1 : index
    %c1_112 = arith.constant 1 : index
    %c0_113 = arith.constant 0 : index
    %c0_114 = arith.constant 0 : index
    %83 = vector.load %arg1[%c0_110, %c1_111, %c1_112, %c0_113, %c0_114] : memref<1x4x9x9x4xbf16, #tpu.memory_space<vmem>>, vector<1x1x8x8x4xbf16>
    %84 = vector.shape_cast %83 : vector<1x1x8x8x4xbf16> to vector<8x8x4xbf16>
    %85 = vector.shape_cast %84 : vector<8x8x4xbf16> to vector<64x4xbf16>
    %c0_115 = arith.constant 0 : index
    %c0_116 = arith.constant 0 : index
    %86 = vector.load %arg6[%c0_115, %c0_116] : memref<64x128xf32, #tpu.memory_space<vmem>>, vector<64x128xf32>
    %c9 = arith.constant 9 : index
    %c0_117 = arith.constant 0 : index
    %c0_118 = arith.constant 0 : index
    %87 = vector.load %arg2[%c9, %c0_117, %c0_118] : memref<16x4x128xbf16, #tpu.memory_space<vmem>>, vector<1x4x128xbf16>
    %88 = vector.shape_cast %87 : vector<1x4x128xbf16> to vector<4x128xbf16>
    %cst_119 = arith.constant dense<0.000000e+00> : vector<64x128xf32>
    %89 = tpu.matmul %85, %88, %cst_119 {dimension_numbers = #tpu.dot_dimension_numbers<[1], [0], [0], [1], [0, 0, 1, 1], [], []>} : vector<64x4xbf16>, vector<4x128xbf16>, vector<64x128xf32> -> vector<64x128xf32>
    %90 = arith.addf %86, %89 : vector<64x128xf32>
    %c0_120 = arith.constant 0 : index
    %c0_121 = arith.constant 0 : index
    %91 = vector.load %arg6[%c0_120, %c0_121] : memref<64x128xf32, #tpu.memory_space<vmem>>, vector<64x128xf32>
    tpu.vector_store %arg6[%c0_120, %c0_121], %90 {strides = array<i32>} : memref<64x128xf32, #tpu.memory_space<vmem>>, vector<64x128xf32>,
    %c0_122 = arith.constant 0 : index
    %c0_123 = arith.constant 0 : index
    %c1_124 = arith.constant 1 : index
    %c1_125 = arith.constant 1 : index
    %c0_126 = arith.constant 0 : index
    %92 = vector.load %arg1[%c0_122, %c0_123, %c1_124, %c1_125, %c0_126] : memref<1x4x9x9x4xbf16, #tpu.memory_space<vmem>>, vector<1x1x8x8x4xbf16>
    %93 = vector.shape_cast %92 : vector<1x1x8x8x4xbf16> to vector<8x8x4xbf16>
    %94 = vector.shape_cast %93 : vector<8x8x4xbf16> to vector<64x4xbf16>
    %c0_127 = arith.constant 0 : index
    %c0_128 = arith.constant 0 : index
    %95 = vector.load %arg6[%c0_127, %c0_128] : memref<64x128xf32, #tpu.memory_space<vmem>>, vector<64x128xf32>
    %c10 = arith.constant 10 : index
    %c0_129 = arith.constant 0 : index
    %c0_130 = arith.constant 0 : index
    %96 = vector.load %arg2[%c10, %c0_129, %c0_130] : memref<16x4x128xbf16, #tpu.memory_space<vmem>>, vector<1x4x128xbf16>
    %97 = vector.shape_cast %96 : vector<1x4x128xbf16> to vector<4x128xbf16>
    %cst_131 = arith.constant dense<0.000000e+00> : vector<64x128xf32>
    %98 = tpu.matmul %94, %97, %cst_131 {dimension_numbers = #tpu.dot_dimension_numbers<[1], [0], [0], [1], [0, 0, 1, 1], [], []>} : vector<64x4xbf16>, vector<4x128xbf16>, vector<64x128xf32> -> vector<64x128xf32>
    %99 = arith.addf %95, %98 : vector<64x128xf32>
    %c0_132 = arith.constant 0 : index
    %c0_133 = arith.constant 0 : index
    %100 = vector.load %arg6[%c0_132, %c0_133] : memref<64x128xf32, #tpu.memory_space<vmem>>, vector<64x128xf32>
    tpu.vector_store %arg6[%c0_132, %c0_133], %99 {strides = array<i32>} : memref<64x128xf32, #tpu.memory_space<vmem>>, vector<64x128xf32>,
    %c0_134 = arith.constant 0 : index
    %c1_135 = arith.constant 1 : index
    %c1_136 = arith.constant 1 : index
    %c1_137 = arith.constant 1 : index
    %c0_138 = arith.constant 0 : index
    %101 = vector.load %arg1[%c0_134, %c1_135, %c1_136, %c1_137, %c0_138] : memref<1x4x9x9x4xbf16, #tpu.memory_space<vmem>>, vector<1x1x8x8x4xbf16>
    %102 = vector.shape_cast %101 : vector<1x1x8x8x4xbf16> to vector<8x8x4xbf16>
    %103 = vector.shape_cast %102 : vector<8x8x4xbf16> to vector<64x4xbf16>
    %c0_139 = arith.constant 0 : index
    %c0_140 = arith.constant 0 : index
    %104 = vector.load %arg6[%c0_139, %c0_140] : memref<64x128xf32, #tpu.memory_space<vmem>>, vector<64x128xf32>
    %c11 = arith.constant 11 : index
    %c0_141 = arith.constant 0 : index
    %c0_142 = arith.constant 0 : index
    %105 = vector.load %arg2[%c11, %c0_141, %c0_142] : memref<16x4x128xbf16, #tpu.memory_space<vmem>>, vector<1x4x128xbf16>
    %106 = vector.shape_cast %105 : vector<1x4x128xbf16> to vector<4x128xbf16>
    %cst_143 = arith.constant dense<0.000000e+00> : vector<64x128xf32>
    %107 = tpu.matmul %103, %106, %cst_143 {dimension_numbers = #tpu.dot_dimension_numbers<[1], [0], [0], [1], [0, 0, 1, 1], [], []>} : vector<64x4xbf16>, vector<4x128xbf16>, vector<64x128xf32> -> vector<64x128xf32>
    %108 = arith.addf %104, %107 : vector<64x128xf32>
    %c0_144 = arith.constant 0 : index
    %c0_145 = arith.constant 0 : index
    %109 = vector.load %arg6[%c0_144, %c0_145] : memref<64x128xf32, #tpu.memory_space<vmem>>, vector<64x128xf32>
    tpu.vector_store %arg6[%c0_144, %c0_145], %108 {strides = array<i32>} : memref<64x128xf32, #tpu.memory_space<vmem>>, vector<64x128xf32>,
    %c0_146 = arith.constant 0 : index
    %c2_147 = arith.constant 2 : index
    %c1_148 = arith.constant 1 : index
    %c0_149 = arith.constant 0 : index
    %c0_150 = arith.constant 0 : index
    %110 = vector.load %arg1[%c0_146, %c2_147, %c1_148, %c0_149, %c0_150] : memref<1x4x9x9x4xbf16, #tpu.memory_space<vmem>>, vector<1x1x8x8x4xbf16>
    %111 = vector.shape_cast %110 : vector<1x1x8x8x4xbf16> to vector<8x8x4xbf16>
    %112 = vector.shape_cast %111 : vector<8x8x4xbf16> to vector<64x4xbf16>
    %c0_151 = arith.constant 0 : index
    %c0_152 = arith.constant 0 : index
    %113 = vector.load %arg6[%c0_151, %c0_152] : memref<64x128xf32, #tpu.memory_space<vmem>>, vector<64x128xf32>
    %c12 = arith.constant 12 : index
    %c0_153 = arith.constant 0 : index
    %c0_154 = arith.constant 0 : index
    %114 = vector.load %arg2[%c12, %c0_153, %c0_154] : memref<16x4x128xbf16, #tpu.memory_space<vmem>>, vector<1x4x128xbf16>
    %115 = vector.shape_cast %114 : vector<1x4x128xbf16> to vector<4x128xbf16>
    %cst_155 = arith.constant dense<0.000000e+00> : vector<64x128xf32>
    %116 = tpu.matmul %112, %115, %cst_155 {dimension_numbers = #tpu.dot_dimension_numbers<[1], [0], [0], [1], [0, 0, 1, 1], [], []>} : vector<64x4xbf16>, vector<4x128xbf16>, vector<64x128xf32> -> vector<64x128xf32>
    %117 = arith.addf %113, %116 : vector<64x128xf32>
    %c0_156 = arith.constant 0 : index
    %c0_157 = arith.constant 0 : index
    %118 = vector.load %arg6[%c0_156, %c0_157] : memref<64x128xf32, #tpu.memory_space<vmem>>, vector<64x128xf32>
    tpu.vector_store %arg6[%c0_156, %c0_157], %117 {strides = array<i32>} : memref<64x128xf32, #tpu.memory_space<vmem>>, vector<64x128xf32>,
    %c0_158 = arith.constant 0 : index
    %c3_159 = arith.constant 3 : index
    %c1_160 = arith.constant 1 : index
    %c0_161 = arith.constant 0 : index
    %c0_162 = arith.constant 0 : index
    %119 = vector.load %arg1[%c0_158, %c3_159, %c1_160, %c0_161, %c0_162] : memref<1x4x9x9x4xbf16, #tpu.memory_space<vmem>>, vector<1x1x8x8x4xbf16>
    %120 = vector.shape_cast %119 : vector<1x1x8x8x4xbf16> to vector<8x8x4xbf16>
    %121 = vector.shape_cast %120 : vector<8x8x4xbf16> to vector<64x4xbf16>
    %c0_163 = arith.constant 0 : index
    %c0_164 = arith.constant 0 : index
    %122 = vector.load %arg6[%c0_163, %c0_164] : memref<64x128xf32, #tpu.memory_space<vmem>>, vector<64x128xf32>
    %c13 = arith.constant 13 : index
    %c0_165 = arith.constant 0 : index
    %c0_166 = arith.constant 0 : index
    %123 = vector.load %arg2[%c13, %c0_165, %c0_166] : memref<16x4x128xbf16, #tpu.memory_space<vmem>>, vector<1x4x128xbf16>
    %124 = vector.shape_cast %123 : vector<1x4x128xbf16> to vector<4x128xbf16>
    %cst_167 = arith.constant dense<0.000000e+00> : vector<64x128xf32>
    %125 = tpu.matmul %121, %124, %cst_167 {dimension_numbers = #tpu.dot_dimension_numbers<[1], [0], [0], [1], [0, 0, 1, 1], [], []>} : vector<64x4xbf16>, vector<4x128xbf16>, vector<64x128xf32> -> vector<64x128xf32>
    %126 = arith.addf %122, %125 : vector<64x128xf32>
    %c0_168 = arith.constant 0 : index
    %c0_169 = arith.constant 0 : index
    %127 = vector.load %arg6[%c0_168, %c0_169] : memref<64x128xf32, #tpu.memory_space<vmem>>, vector<64x128xf32>
    tpu.vector_store %arg6[%c0_168, %c0_169], %126 {strides = array<i32>} : memref<64x128xf32, #tpu.memory_space<vmem>>, vector<64x128xf32>,
    %c0_170 = arith.constant 0 : index
    %c2_171 = arith.constant 2 : index
    %c1_172 = arith.constant 1 : index
    %c1_173 = arith.constant 1 : index
    %c0_174 = arith.constant 0 : index
    %128 = vector.load %arg1[%c0_170, %c2_171, %c1_172, %c1_173, %c0_174] : memref<1x4x9x9x4xbf16, #tpu.memory_space<vmem>>, vector<1x1x8x8x4xbf16>
    %129 = vector.shape_cast %128 : vector<1x1x8x8x4xbf16> to vector<8x8x4xbf16>
    %130 = vector.shape_cast %129 : vector<8x8x4xbf16> to vector<64x4xbf16>
    %c0_175 = arith.constant 0 : index
    %c0_176 = arith.constant 0 : index
    %131 = vector.load %arg6[%c0_175, %c0_176] : memref<64x128xf32, #tpu.memory_space<vmem>>, vector<64x128xf32>
    %c14 = arith.constant 14 : index
    %c0_177 = arith.constant 0 : index
    %c0_178 = arith.constant 0 : index
    %132 = vector.load %arg2[%c14, %c0_177, %c0_178] : memref<16x4x128xbf16, #tpu.memory_space<vmem>>, vector<1x4x128xbf16>
    %133 = vector.shape_cast %132 : vector<1x4x128xbf16> to vector<4x128xbf16>
    %cst_179 = arith.constant dense<0.000000e+00> : vector<64x128xf32>
    %134 = tpu.matmul %130, %133, %cst_179 {dimension_numbers = #tpu.dot_dimension_numbers<[1], [0], [0], [1], [0, 0, 1, 1], [], []>} : vector<64x4xbf16>, vector<4x128xbf16>, vector<64x128xf32> -> vector<64x128xf32>
    %135 = arith.addf %131, %134 : vector<64x128xf32>
    %c0_180 = arith.constant 0 : index
    %c0_181 = arith.constant 0 : index
    %136 = vector.load %arg6[%c0_180, %c0_181] : memref<64x128xf32, #tpu.memory_space<vmem>>, vector<64x128xf32>
    tpu.vector_store %arg6[%c0_180, %c0_181], %135 {strides = array<i32>} : memref<64x128xf32, #tpu.memory_space<vmem>>, vector<64x128xf32>,
    %c0_182 = arith.constant 0 : index
    %c3_183 = arith.constant 3 : index
    %c1_184 = arith.constant 1 : index
    %c1_185 = arith.constant 1 : index
    %c0_186 = arith.constant 0 : index
    %137 = vector.load %arg1[%c0_182, %c3_183, %c1_184, %c1_185, %c0_186] : memref<1x4x9x9x4xbf16, #tpu.memory_space<vmem>>, vector<1x1x8x8x4xbf16>
    %138 = vector.shape_cast %137 : vector<1x1x8x8x4xbf16> to vector<8x8x4xbf16>
    %139 = vector.shape_cast %138 : vector<8x8x4xbf16> to vector<64x4xbf16>
    %c0_187 = arith.constant 0 : index
    %c0_188 = arith.constant 0 : index
    %140 = vector.load %arg6[%c0_187, %c0_188] : memref<64x128xf32, #tpu.memory_space<vmem>>, vector<64x128xf32>
    %c15 = arith.constant 15 : index
    %c0_189 = arith.constant 0 : index
    %c0_190 = arith.constant 0 : index
    %141 = vector.load %arg2[%c15, %c0_189, %c0_190] : memref<16x4x128xbf16, #tpu.memory_space<vmem>>, vector<1x4x128xbf16>
    %142 = vector.shape_cast %141 : vector<1x4x128xbf16> to vector<4x128xbf16>
    %cst_191 = arith.constant dense<0.000000e+00> : vector<64x128xf32>
    %143 = tpu.matmul %139, %142, %cst_191 {dimension_numbers = #tpu.dot_dimension_numbers<[1], [0], [0], [1], [0, 0, 1, 1], [], []>} : vector<64x4xbf16>, vector<4x128xbf16>, vector<64x128xf32> -> vector<64x128xf32>
    %144 = arith.addf %140, %143 : vector<64x128xf32>
    %c0_192 = arith.constant 0 : index
    %c0_193 = arith.constant 0 : index
    %145 = vector.load %arg6[%c0_192, %c0_193] : memref<64x128xf32, #tpu.memory_space<vmem>>, vector<64x128xf32>
    tpu.vector_store %arg6[%c0_192, %c0_193], %144 {strides = array<i32>} : memref<64x128xf32, #tpu.memory_space<vmem>>, vector<64x128xf32>,
    %c0_194 = arith.constant 0 : index
    %c0_195 = arith.constant 0 : index
    %146 = vector.load %arg6[%c0_194, %c0_195] : memref<64x128xf32, #tpu.memory_space<vmem>>, vector<64x128xf32>
    %c0_196 = arith.constant 0 : index
    %c0_197 = arith.constant 0 : index
    %c0_198 = arith.constant 0 : index
    %147 = vector.load %arg3[%c0_196, %c0_197, %c0_198] : memref<1x64x128xf32, #tpu.memory_space<vmem>>, vector<1x64x128xf32>
    %148 = vector.shape_cast %147 : vector<1x64x128xf32> to vector<64x128xf32>
    %149 = vector.shape_cast %146 : vector<64x128xf32> to vector<1x64x128xf32>
    tpu.vector_store %arg3[%c0_196, %c0_197, %c0_198], %149 {strides = array<i32>} : memref<1x64x128xf32, #tpu.memory_space<vmem>>, vector<1x64x128xf32>,
    %cst_199 = arith.constant dense<0.000000e+00> : vector<128xf32>
    %150 = vector.multi_reduction <add>, %146, %cst_199 [0] : vector<64x128xf32> to vector<128xf32>
    %151 = vector.shape_cast %150 : vector<128xf32> to vector<1x128xf32>
    %152 = vector.shape_cast %151 : vector<1x128xf32> to vector<1x1x128xf32>
    %c0_200 = arith.constant 0 : index
    %c0_201 = arith.constant 0 : index
    %c0_202 = arith.constant 0 : index
    %153 = vector.load %arg4[%c0_200, %c0_201, %c0_202] : memref<1x1x128xf32, #tpu.memory_space<vmem>>, vector<1x1x128xf32>
    tpu.vector_store %arg4[%c0_200, %c0_201, %c0_202], %152 {strides = array<i32>} : memref<1x1x128xf32, #tpu.memory_space<vmem>>, vector<1x1x128xf32>,
    %154 = arith.mulf %146, %146 : vector<64x128xf32>
    %cst_203 = arith.constant dense<0.000000e+00> : vector<128xf32>
    %155 = vector.multi_reduction <add>, %154, %cst_203 [0] : vector<64x128xf32> to vector<128xf32>
    %156 = vector.shape_cast %155 : vector<128xf32> to vector<1x128xf32>
    %157 = vector.shape_cast %156 : vector<1x128xf32> to vector<1x1x128xf32>
    %c0_204 = arith.constant 0 : index
    %c0_205 = arith.constant 0 : index
    %c0_206 = arith.constant 0 : index
    %158 = vector.load %arg5[%c0_204, %c0_205, %c0_206] : memref<1x1x128xf32, #tpu.memory_space<vmem>>, vector<1x1x128xf32>
    tpu.vector_store %arg5[%c0_204, %c0_205, %c0_206], %157 {strides = array<i32>} : memref<1x1x128xf32, #tpu.memory_space<vmem>>, vector<1x1x128xf32>,
    return
  }
  func.func @transform_0(%arg0: i32) -> (i32, i32, i32, i32, i32) {
    %c0_i32 = arith.constant 0 : i32
    %c0_i32_0 = arith.constant 0 : i32
    %c0_i32_1 = arith.constant 0 : i32
    %c0_i32_2 = arith.constant 0 : i32
    %c0_i32_3 = arith.constant 0 : i32
    return %arg0, %c0_i32, %c0_i32_0, %c0_i32_1, %c0_i32_2 : i32, i32, i32, i32, i32
  }
  func.func @transform_1(%arg0: i32) -> (i32, i32, i32) {
    %c0_i32 = arith.constant 0 : i32
    %c0_i32_0 = arith.constant 0 : i32
    %c0_i32_1 = arith.constant 0 : i32
    %c0_i32_2 = arith.constant 0 : i32
    return %c0_i32, %c0_i32_0, %c0_i32_1 : i32, i32, i32
  }
  func.func @transform_2(%arg0: i32) -> (i32, i32, i32) {
    %c0_i32 = arith.constant 0 : i32
    %c0_i32_0 = arith.constant 0 : i32
    %c0_i32_1 = arith.constant 0 : i32
    return %arg0, %c0_i32, %c0_i32_0 : i32, i32, i32
  }
  func.func @transform_3(%arg0: i32) -> (i32, i32, i32) {
    %c0_i32 = arith.constant 0 : i32
    %c0_i32_0 = arith.constant 0 : i32
    %c0_i32_1 = arith.constant 0 : i32
    return %arg0, %c0_i32, %c0_i32_0 : i32, i32, i32
  }
  func.func @transform_4(%arg0: i32) -> (i32, i32, i32) {
    %c0_i32 = arith.constant 0 : i32
    %c0_i32_0 = arith.constant 0 : i32
    %c0_i32_1 = arith.constant 0 : i32
    return %arg0, %c0_i32, %c0_i32_0 : i32, i32, i32
  }
}

</mosaic_0001>

<bundles_post_ra>
// kernel: dfc_encoder_block.3
= control target key start
LH: loop header
LB: loop body
LE: loop exit
PB: predicated region body
PF: predicated region fallthrough
CT: control target
= control target key end

     0   :  { %10 = vsyncpa [#allocation3], 0  ;;  %s670_s0 = inlined_call_operand.vmem [shape: f32[128,128], index: 0, kind: input, shape index: {}]   ;;  %s671_s1 = inlined_call_operand.vmem [shape: f32[2,1,128], index: 1, kind: input, shape index: {}]   ;;  %s672_s2 = inlined_call_operand.vmem [shape: f32[2,1,128], index: 2, kind: input, shape index: {}]   ;;  %s673_s3 = inlined_call_operand.vmem [shape: f32[1,128], index: 3, kind: input, shape index: {}]   ;;  %s674_s4 = inlined_call_operand.vmem [shape: f32[1,128], index: 4, kind: input, shape index: {}]   ;;  %s675_s5 = inlined_call_operand.hbm [shape: f32[128,128], index: 5, kind: output, shape index: {}]  }
   0x1   :  { %12 = vsyncpa [#allocation3 + $0x1], 0  ;;  %s546_s18 = smov 0   ;;  %s548_s19 = smov 0  }
   0x2   :  { %s550_s20 = smov 0   ;;  %s552_s21 = smov 0  }
   0x3 LB: > { %s567_s22 = sadd.s32 4294967295, %s511_s21   ;;  %s393_s23 = sadd.s32 4294967294, %s511_s21   ;;  %s511_s21 = sphi %s552_s21, %s681_s21   ;;  %s507_s20 = sphi %s550_s20, %s680_s20   ;;  %s503_s19 = sphi %s548_s19, %s679_s19   ;;  %s499_s18 = sphi %s546_s18, %s678_s18  }
   0x4   : > { %s571_s24 = sadd.s32 1, %s511_s21   ;;  %s135_s25 = sadd.s32 1, %s507_s20 }
   0x5   : > { %s132_s26 = ssub.s32 %s511_s21, %s571_s24  ;;  %p145_p0 = scmp.ne.s32.totalorder %s507_s20, %s503_s19 }
   0x6   : > { %p133_p1 = scmp.eq.s32.totalorder %s132_s26, 0  ;;  %p146_p2 = scmp.eq.s32.totalorder %s567_s22, 1 }
   0x7   : > { %p151_p3 = scmp.ne.s32.totalorder %s503_s19, %s499_s18  ;;  %p152_p4 = scmp.eq.s32.totalorder %s393_s23, 1 }
   0x8   : > { %s582_s27 = scalar_select %p133_p1, %s507_s20, %s135_s25  }
   0x9   : > { %p584_p5 = por %p146_p2, %p145_p0  ;;  %p588_p6 = por %p152_p4, %p151_p3 }
   0xa   : > { %p396_p7 = scmp.ge.s32.totalorder %s511_s21, 1  ;;  %p191_p8 = scmp.lt.s32.totalorder %s511_s21, 3 }
   0xc   : > { %p192_p9 = pnand %p396_p7, %p191_p8 }
   0xd   : > { %v226_v0 = vld [vmem:[%s671_s1] sm:$0x1] (!%p192_p9)  ;;  %v227_v1 = vld [vmem:[%s671_s1 + $0x1] sm:$0x1] (!%p192_p9)  ;;  %vm228_vm0 = vcmask (!%p192_p9), 1040384   ;;  %s398_s13 = sshll.u32 (!%p192_p9), %s567_s22, 3  ;;  %v258_v16 = vlaneseq (!%p192_p9) }
   0xe   : > { %195 = sbr.rel (%p192_p9) target bundleno = 71 (0x47), region = 40  ;;  %v232_v2 = vld [vmem:[%s672_s2] sm:$0x1] (!%p192_p9)  ;;  %v229_v3 = vsel (!%p192_p9), %vm228_vm0, %v226_v0, 0.0  ;;  %v230_v4 = vsel (!%p192_p9), %vm228_vm0, %v227_v1, 0.0  ;;  %p220_p10 = scmp.lt.s32.totalorder (!%p192_p9), %s398_s13, 15 }
   0xf   : > { %v233_v5 = vld [vmem:[%s672_s2 + $0x1] sm:$0x1] (!%p192_p9)  ;;  %v234_v6 = vsel (!%p192_p9), %vm228_vm0, %v232_v2, 0.0  ;;  %v231_v7 = vadd.f32 (!%p192_p9), %v230_v4, %v229_v3  ;;  %v259_v17 = vshrl.u32 (!%p192_p9), %v258_v16, 7  ;;  %v242_v18 = vld [vmem:[%s673_s3] sm:$0x1] (!%p192_p9) }
  0x10   : > { %v235_v8 = vsel (!%p192_p9), %vm228_vm0, %v233_v5, 0.0  ;;  %v246_v22 = vld [vmem:[%s674_s4] sm:$0x1] (!%p192_p9)  ;;  %s216_s6 = sand.u32 (!%p192_p9), 1, %s503_s19   ;;  %s405_s10 = sshll.u32 (!%p192_p9), %s567_s22, 10 }
  0x11   : > { %v236_v9 = vadd.f32 (!%p192_p9), %v235_v8, %v234_v6  ;;  %v237_v10 = vmul.f32 (!%p192_p9), 0.0078125, %v231_v7  ;;  %v260_v19 = vsub.s32 (!%p192_p9), 0, %v259_v17  ;;  %s397_s7 = sshll.u32 (!%p192_p9), %s216_s6, 6  ;;  %s625_s12 = scalar_lea.hbm (!%p192_p9), %s675_s5, %s405_s10 }
  0x12   : > { %s218_s8 = scalar_lea.vmem (!%p192_p9), [#allocation2], %s397_s7  ;;  %s513_s15 = smov (!%p192_p9), [#allocation2]  }
  0x13   : > { %v238_v11 = vmul.f32 (!%p192_p9), 0.0078125, %v236_v9  ;;  %v239_v12 = vmul.f32 (!%p192_p9), %v237_v10, %v237_v10  ;;  %s331_s9 = sshll.u32 (!%p192_p9), %s218_s8, 4  ;;  %s453_s16 = sshll.u32 (!%p192_p9), %s513_s15, 4  ;;  %s620_s9 = int_to_ptr.vmem [resolvable:$true] %s331_s9  ;;  %s454_s16 = int_to_ptr.vmem [resolvable:$false] %s453_s16 }
  0x14   : > { %p456_p0 = scmp.lt.s32.totalorder (!%p192_p9), %s620_s9, %s454_s16 }
  0x15   : > { %v240_v13 = vsub.f32 %v238_v11, %v239_v12  ;;  %s683_s13 = smov (!%p220_p10, %s398_s13), 15 }
  0x16   : > { %s399_s14 = sshll.u32 %s683_s13, 3  ;;  %s629_s13 = scalar_lea.sflag [#allocation3], %s216_s6 }
  0x17   : > { %v241_v14 = vmax.f32 %v240_v13, 0.0  ;;  %s223_s17 = scalar_lea.vmem %s670_s0, %s399_s14  ;;  %s449_s14 = scalar_lea.vmem %s620_s9, 1024 }
  0x18   : > { %v249_v23 = vld [vmem:[%s223_s17] sm:$0xff]  ;;  %v250_v24 = vld [vmem:[%s223_s17 + $0x8] sm:$0xff]  ;;  %v251_v25 = vld [vmem:[%s223_s17 + $0x10] sm:$0xff]  ;;  %p450_p11 = scmp.ne.s32.totalorder %s620_s9, %s449_s14 }
  0x19   : > { %v243_v15 = vadd.f32 1e-05, %v241_v14  ;;  %v252_v26 = vld [vmem:[%s223_s17 + $0x18] sm:$0xff]  ;;  %v253_v29 = vld [vmem:[%s223_s17 + $0x20] sm:$0xff]  ;;  %v254_v30 = vld [vmem:[%s223_s17 + $0x28] sm:$0xff] }
  0x1a   : > { %v255_v31 = vld [vmem:[%s223_s17 + $0x30] sm:$0xff]  ;;  %v256_v32 = vld [vmem:[%s223_s17 + $0x38] sm:$0xff]  ;;  %p451_p12 = pnand %p450_p11, %p584_p5  ;;  %s455_s17 = scalar_lea.vmem %s454_s16, 2048 }
  0x1b   : > { %447 = vrsqrt.f32 %v243_v15  ;;  %p457_p1 = scmp.lt.s32.totalorder %s455_s17, %s449_s14 }
  0x1c   : > { %p452_p13 = pneg %p451_p12 }
  0x1d   : > { %p458_p2 = por %p457_p1, %p456_p0 }
  0x1f   : > { %p459_p3 = pnand %p458_p2, %p452_p13 }
  0x25   : > { %v448_v20 = vpop.eup %447 }
  0x26   : > { %v245_v21 = vmul.f32 %v448_v20, %v242_v18 }
  0x28   : > { %v247_v27 = vmul.f32 %v245_v21, %v237_v10  ;;  %v261_v28 = vrot.slane %v245_v21, %v260_v19 }
  0x2a   : > { %v248_v33 = vsub.f32 %v246_v22, %v247_v27  ;;  %v263_v34 = vmul.f32 %v261_v28, %v249_v23  ;;  %v264_v35 = vmul.f32 %v261_v28, %v250_v24  ;;  %v265_v36 = vmul.f32 %v261_v28, %v251_v25 }
  0x2b   : > { %v266_v37 = vmul.f32 %v261_v28, %v252_v26  ;;  %v267_v38 = vmul.f32 %v261_v28, %v253_v29  ;;  %v268_v39 = vmul.f32 %v261_v28, %v254_v30  ;;  %v269_v40 = vmul.f32 %v261_v28, %v255_v31 }
  0x2c   : > { %v275_v41 = vrot.slane %v248_v33, %v260_v19  ;;  %v270_v42 = vmul.f32 %v261_v28, %v256_v32 }
  0x2e   : > { %v277_v43 = vadd.f32 %v275_v41, %v263_v34  ;;  %v278_v44 = vadd.f32 %v275_v41, %v264_v35  ;;  %v279_v45 = vadd.f32 %v275_v41, %v265_v36  ;;  %v280_v46 = vadd.f32 %v275_v41, %v266_v37 }
  0x2f   : > { %v281_v47 = vadd.f32 %v275_v41, %v267_v38  ;;  %v282_v48 = vadd.f32 %v275_v41, %v268_v39  ;;  %v283_v49 = vadd.f32 %v275_v41, %v269_v40  ;;  %v284_v50 = vadd.f32 %v275_v41, %v270_v42 }
  0x30   : > { %vm285_vm1 = vcmp.ge.f32.partialorder %v277_v43, 0.0  ;;  %v293_v51 = vmul.f32 0.2, %v277_v43  ;;  %vm286_vm2 = vcmp.ge.f32.partialorder %v278_v44, 0.0  ;;  %v294_v52 = vmul.f32 0.2, %v278_v44 }
  0x31   : > { %vm287_vm3 = vcmp.ge.f32.partialorder %v279_v45, 0.0  ;;  %v295_v53 = vmul.f32 0.2, %v279_v45  ;;  %vm288_vm4 = vcmp.ge.f32.partialorder %v280_v46, 0.0  ;;  %v296_v54 = vmul.f32 0.2, %v280_v46 }
  0x32   : > { %v301_v55 = vsel %vm285_vm1, %v277_v43, %v293_v51  ;;  %v302_v56 = vsel %vm286_vm2, %v278_v44, %v294_v52  ;;  %vm289_vm5 = vcmp.ge.f32.partialorder %v281_v47, 0.0  ;;  %v297_v57 = vmul.f32 0.2, %v281_v47 }
  0x33   : > { %309 = vst [vmem:[%s218_s8] sm:$0xff] %v301_v55  ;;  %310 = vst [vmem:[%s218_s8 + $0x8] sm:$0xff] %v302_v56  ;;  %v303_v58 = vsel %vm287_vm3, %v279_v45, %v295_v53  ;;  %v304_v59 = vsel %vm288_vm4, %v280_v46, %v296_v54  ;;  %vm290_vm6 = vcmp.ge.f32.partialorder %v282_v48, 0.0  ;;  %v298_v60 = vmul.f32 0.2, %v282_v48 }
  0x34   : > { %311 = vst [vmem:[%s218_s8 + $0x10] sm:$0xff] %v303_v58  ;;  %312 = vst [vmem:[%s218_s8 + $0x18] sm:$0xff] %v304_v59  ;;  %v305_v61 = vsel %vm289_vm5, %v281_v47, %v297_v57  ;;  %vm291_vm7 = vcmp.ge.f32.partialorder %v283_v49, 0.0  ;;  %v299_v62 = vmul.f32 0.2, %v283_v49  ;;  %vm292_vm8 = vcmp.ge.f32.partialorder %v284_v50, 0.0 }
  0x35   : > { %313 = vst [vmem:[%s218_s8 + $0x20] sm:$0xff] %v305_v61  ;;  %v306_v63 = vsel %vm290_vm6, %v282_v48, %v298_v60  ;;  %v300_v0 = vmul.f32 0.2, %v284_v50 }
  0x36   : > { %314 = vst [vmem:[%s218_s8 + $0x28] sm:$0xff] %v306_v63  ;;  %v307_v1 = vsel %vm291_vm7, %v283_v49, %v299_v62 }
  0x37   : > { %315 = vst [vmem:[%s218_s8 + $0x30] sm:$0xff] %v307_v1  ;;  %v308_v2 = vsel %vm292_vm8, %v284_v50, %v300_v0 }
  0x38   : > { %316 = vst [vmem:[%s218_s8 + $0x38] sm:$0xff] %v308_v2 }
  0x39   : > { %462 = shalt.err (!%p459_p3)
}
  0x3a   : > { %s463_s23 = scalar_lea.hbm %s625_s12, 1024  ;;  %s467_s30 = scalar_lea.hbm %s675_s5, 2048 }
  0x3b   : > { %p464_p4 = scmp.ne.s32.totalorder %s625_s12, %s463_s23  ;;  %p468_p9 = scmp.lt.u32.totalorder %s625_s12, %s675_s5 }
  0x3c   : > { %p469_p10 = scmp.lt.u32.totalorder %s467_s30, %s463_s23  ;;  %p471_p12 = scmp.lt.u32.totalorder %s463_s23, %s625_s12 }
  0x3d   : > { %p465_p7 = pnand %p464_p4, %p584_p5 }
  0x3e   : > { %p470_p11 = por %p469_p10, %p468_p9 }
  0x3f   : > { %p466_p8 = pneg %p465_p7 }
  0x40   : > { %p472_p13 = por %p471_p12, %p470_p11 }
  0x42   : > { %p473_p0 = pnand %p472_p13, %p466_p8 }
  0x44   : > { %476 = shalt.err (!%p473_p0)
}
  0x45   : > { %s514_s8 = smov 128   ;;  %s515_s10 = smov 8  }
  0x46   : > { %406 = dma.vmem_to_hbm [thread:$0]  (%p584_p5), %s620_s9, 1024, %s625_s12, %s629_s13, %s514_s8, %s514_s8, %s515_s10  }
  0x47 PF: > { %p412_p1 = scmp.ge.s32.totalorder %s511_s21, 2  ;;  %s346_s22 = sand.u32 1, %s499_s18  }
  0x48   : > { %s347_s11 = scalar_lea.sflag [#allocation3], %s346_s22 }
  0x49   : > { %p409_p2 = pnand %p412_p1, %p588_p6 }
  0x4b   : > { %494 = dma.done.wait (!%p409_p2), %s347_s11, 1024  }
  0x4c   : > { %496 = vsyncadd (!%p409_p2), %s347_s11, 4294966272  ;;  %p15_p3 = scmp.ge.s32.totalorder %s571_s24, 4   ;;  %s678_s18 = smov %s503_s19 }
  0x4d   : > { %s679_s19 = smov %s507_s20  ;;  %s680_s20 = smov %s582_s27 }
  0x4e   : > { %s681_s21 = smov %s571_s24  ;;  %17 = sbr.rel (!%p15_p3) target bundleno = 3 (0x3), region = 75 }
  0x55   :  { %352 = vsyncpa [#allocation3], 1 }
  0x56   :  { %354 = vsyncpa [#allocation3 + $0x1], 1 }

// kernel: dfc_encoder_block.2
= control target key start
LH: loop header
LB: loop body
LE: loop exit
PB: predicated region body
PF: predicated region fallthrough
CT: control target
= control target key end

     0   :  { %s4204_s15 = smov 0   ;;  %s4748_s0 = inlined_call_operand.vmem [shape: bf16[2,4,9,9,4], index: 0, kind: input, shape index: {}]   ;;  %s4749_s1 = inlined_call_operand.vmem [shape: bf16[16,4,128], index: 1, kind: input, shape index: {}]   ;;  %s4750_s2 = inlined_call_operand.vmem [shape: f32[2,64,128], index: 2, kind: output, shape index: {0}]   ;;  %s4751_s3 = inlined_call_operand.vmem [shape: f32[2,1,128], index: 3, kind: output, shape index: {1}]   ;;  %s4752_s4 = inlined_call_operand.vmem [shape: f32[2,1,128], index: 4, kind: output, shape index: {2}]  }
   0x1 LB: > { %s3432_s16 = sadd.s32 4294967295, %s4177_s15   ;;  %p3436_p0 = scmp.ge.s32.totalorder %s4177_s15, 1  ;;  %s4177_s15 = sphi %s4204_s15, %s15_s15  }
   0x2   : > { %p167_p1 = scmp.lt.s32.totalorder %s4177_s15, 3 }
   0x4   : > { %p168_p2 = pnand %p3436_p0, %p167_p1 }
   0x5   : > { %v240_v0 = vld [vmem:[%s4749_s1] sm:$0x3] (!%p168_p2)  ;;  %vm274_vm0 = vcmask (!%p168_p2), 1041408   ;;  %v3591_v1 = vld [vmem:[%s4749_s1 + $0x10] sm:$0x3] (!%p168_p2)  ;;  %p199_p3 = scmp.lt.s32.totalorder (!%p168_p2), %s3432_s16, 1 }
   0x6   : > { %171 = sbr.rel (%p168_p2) target bundleno = 423 (0x1a7), region = 28  ;;  %4114 = vmatprep.subr.msk.bf16.mxu1 (!%p168_p2), %vm274_vm0, %v240_v0  ;;  %4122 = vmatprep.subr.msk.bf16.mxu0 (!%p168_p2), %vm274_vm0, %v3591_v1  ;;  %v276_v2 = vsel (!%p168_p2), %vm274_vm0, %v240_v0, 0  ;;  %v1803_v3 = vsel (!%p168_p2), %vm274_vm0, %v3591_v1, 0  ;;  %v3456_v4 = vld [vmem:[%s4749_s1 + $0x2] sm:$0x3] (!%p168_p2)  ;;  %vm261_vm1 = vcmask (!%p168_p2), 31744  }
   0x7   : > { %3835 = vmatpush3.bf16.msra.mxu1 (!%p168_p2), %v276_v2  ;;  %3915 = vmatpush3.bf16.msra.mxu0 (!%p168_p2), %v1803_v3  ;;  %v3608_v5 = vld [vmem:[%s4749_s1 + $0x12] sm:$0x3] (!%p168_p2)  ;;  %v411_v6 = vsel (!%p168_p2), %vm274_vm0, %v3456_v4, 0  ;;  %v3465_v11 = vld [vmem:[%s4749_s1 + $0x4] sm:$0x3] (!%p168_p2) }
   0x8   : > { %4115 = vmatprep.subr.msk.bf16.mxu1 (!%p168_p2), %vm274_vm0, %v3456_v4  ;;  %4123 = vmatprep.subr.msk.bf16.mxu0 (!%p168_p2), %vm274_vm0, %v3608_v5  ;;  %v1938_v7 = vsel (!%p168_p2), %vm274_vm0, %v3608_v5, 0  ;;  %v3633_v13 = vld [vmem:[%s4749_s1 + $0x14] sm:$0x3] (!%p168_p2)  ;;  %v3490_v18 = vld [vmem:[%s4749_s1 + $0x6] sm:$0x3] (!%p168_p2)  ;;  %v660_v22 = vsel (!%p168_p2), %vm274_vm0, %v3465_v11, 0 }
   0x9   : > { %v4268_v19 = vld [vmem:[%s4749_s1 + $0x16] sm:$0x3] (!%p168_p2)  ;;  %v2184_v23 = vsel (!%p168_p2), %vm274_vm0, %v3633_v13, 0  ;;  %vm510_vm2 = vsmask.f32 (!%p168_p2), 3328  ;;  %v4278_v24 = vsel (!%p168_p2), %vm274_vm0, %v3490_v18, 0 }
   0xa   : > { %vm511_vm3 = vsmask.f32 (!%p168_p2), 7440  ;;  %v4282_v25 = vsel (!%p168_p2), %vm274_vm0, %v4268_v19, 0 }
   0xb   : > { %vm4303_vm4 = vmor (!%p168_p2), %vm510_vm2, %vm511_vm3 }
   0xd   : > { %s4756_s16 = smov (!%p199_p3, %s3432_s16), 1 }
   0xe   : > { %s4130_s25 = smul.u32 288, %s4756_s16  ;;  %s211_s9 = scalar_lea.vmem %s4751_s3, %s4756_s16 }
   0xf   : > { %s214_s12 = scalar_lea.vmem %s4752_s4, %s4756_s16 }
  0x10   : > { %s4236_s28 = scalar_lea.vmem %s4748_s0, %s4130_s25 }
  0x11   : > { %v4139_v8 = vld [vmem:[%s4236_s28] ss:$8 sps:$4 sm:$0xff]   ;;  %v4141_v10 = vld [vmem:[%s4236_s28 + $0x10] ss:$8 sps:$4 sm:$0xff]   ;;  %v495_v30 = vld [vmem:[%s4236_s28 + $0x4] sm:$0x1] }
  0x12   : > { %v4140_v9 = vld [vmem:[%s4236_s28 + $0x8] ss:$8 sps:$4 sm:$0xff]   ;;  %3836 = vmatprep.mubr.msk.bf16.mxu1 %vm261_vm1, %v4139_v8  ;;  %v4142_v12 = vld [vmem:[%s4236_s28 + $0x18] ss:$8 sps:$4 sm:$0xff]   ;;  %v497_v33 = vld [vmem:[%s4236_s28 + $0xc] sm:$0x1] }
  0x13   : > { %3916 = vmatprep.mubr.msk.bf16.mxu0 %vm261_vm1, %v4140_v9  ;;  %3837 = vmatmul.mubr.msk.bf16.vlgmr.msra.gmra.mrb[0].mxu1 %vm261_vm1, %v4141_v10  ;;  %v4143_v14 = vld [vmem:[%s4236_s28 + $0x20] ss:$8 sps:$4 sm:$0xff]   ;;  %v4145_v16 = vld [vmem:[%s4236_s28 + $0x30] ss:$8 sps:$4 sm:$0xff]   ;;  %v523_v36 = vshll.u32 %v495_v30, 16  ;;  %v537_v39 = vshll.u32 %v497_v33, 16 }
  0x14   : > { %3845 = vmatpush3.bf16.msra.mxu1 %v411_v6  ;;  %3917 = vmatmul.mubr.msk.bf16.vlgmr.msra.gmra.mrb[0].mxu0 %vm261_vm1, %v4142_v12  ;;  %v4144_v15 = vld [vmem:[%s4236_s28 + $0x28] ss:$8 sps:$4 sm:$0xff]   ;;  %v4146_v17 = vld [vmem:[%s4236_s28 + $0x38] ss:$8 sps:$4 sm:$0xff]   ;;  %v3618_v41 = vld [vmem:[%s4236_s28 + $0xc] sm:$0x1] }
  0x15   : > { %3925 = vmatpush3.bf16.msra.mxu0 %v1938_v7  ;;  %3840 = vmatprep.mubr.msk.bf16.mxu1 %vm261_vm1, %v4143_v14  ;;  %v4147_v20 = vld [vmem:[%s4236_s28 + $0x48] ss:$8 sps:$4 sm:$0xff]   ;;  %v4149_v26 = vld [vmem:[%s4236_s28 + $0x58] ss:$8 sps:$4 sm:$0xff]   ;;  %v525_v44 = vrot.slane %v523_v36, 5  ;;  %v539_v48 = vrot.slane %v537_v39, 5 }
  0x16   : > { %3920 = vmatprep.mubr.msk.bf16.mxu0 %vm261_vm1, %v4144_v15  ;;  %4116 = vmatprep.subr.msk.bf16.mxu1 %vm274_vm0, %v3465_v11  ;;  %v4148_v21 = vld [vmem:[%s4236_s28 + $0x50] ss:$8 sps:$4 sm:$0xff]   ;;  %v4150_v27 = vld [vmem:[%s4236_s28 + $0x60] ss:$8 sps:$4 sm:$0xff]   ;;  %v3620_v49 = vld [vmem:[%s4236_s28 + $0x14] sm:$0x1] }
  0x17   : > { %4124 = vmatprep.subr.msk.bf16.mxu0 %vm274_vm0, %v3633_v13  ;;  %v4151_v28 = vld [vmem:[%s4236_s28 + $0x68] ss:$8 sps:$4 sm:$0xff]   ;;  %v494_v29 = vld [vmem:[%s4236_s28] sm:$0xf]  ;;  %v2047_v53 = vshll.u32 %v3618_v41, 16  ;;  %v2061_v61 = vshll.u32 %v3620_v49, 16 }
  0x18   : > { %v496_v31 = vld [vmem:[%s4236_s28 + $0x8] sm:$0xf]  ;;  %v4152_v32 = vld [vmem:[%s4236_s28 + $0x70] ss:$8 sps:$4 sm:$0xff]   ;;  %v514_v34 = vshrl.u32 %v494_v29, 16  ;;  %v517_v35 = vshll.u32 %v494_v29, 16 }
  0x19   : > { %v528_v37 = vshrl.u32 %v496_v31, 16  ;;  %v531_v38 = vshll.u32 %v496_v31, 16  ;;  %v3617_v40 = vld [vmem:[%s4236_s28 + $0x8] sm:$0xf]  ;;  %v3619_v46 = vld [vmem:[%s4236_s28 + $0x10] sm:$0xf] }
  0x1a   : > { %v516_v42 = vrot.slane %v514_v34, 4  ;;  %v519_v43 = vrot.slane %v517_v35, 5  ;;  %v2038_v50 = vshrl.u32 %v3617_v40, 16  ;;  %v2041_v51 = vshll.u32 %v3617_v40, 16  ;;  %v498_v56 = vld [vmem:[%s4236_s28 + $0x10] sm:$0xf] }
  0x1b   : > { %3841 = vmatmul.mubr.msk.bf16.gmra.mrb[4].mxu1 %vm261_vm1, %v4145_v16  ;;  %v530_v45 = vrot.slane %v528_v37, 4  ;;  %v533_v47 = vrot.slane %v531_v38, 5  ;;  %v2052_v54 = vshrl.u32 %v3619_v46, 16  ;;  %v2055_v55 = vshll.u32 %v3619_v46, 16  ;;  %v499_v62 = vld [vmem:[%s4236_s28 + $0x14] sm:$0x1] }
  0x1c   : > { %3921 = vmatmul.mubr.msk.bf16.gmra.mrb[4].mxu0 %vm261_vm1, %v4146_v17  ;;  %3846 = vmatprep.mubr.msk.bf16.mxu1 %vm261_vm1, %v4147_v20  ;;  %v520_v52 = vor.u32 %v519_v43, %v516_v42  ;;  %v2040_v59 = vrot.slane %v2038_v50, 4  ;;  %v2043_v60 = vrot.slane %v2041_v51, 5  ;;  %v2049_v0 = vrot.slane %v2047_v53, 5  ;;  %v500_v3 = vld [vmem:[%s4236_s28 + $0x18] sm:$0xf] }
  0x1d   : > { %3926 = vmatprep.mubr.msk.bf16.mxu0 %vm261_vm1, %v4148_v21  ;;  %v534_v58 = vor.u32 %v533_v47, %v530_v45  ;;  %v2054_v1 = vrot.slane %v2052_v54, 4  ;;  %v2057_v2 = vrot.slane %v2055_v55, 5  ;;  %v4153_v4 = vld [vmem:[%s4236_s28 + $0x78] ss:$8 sps:$4 sm:$0xff]   ;;  %v2063_v7 = vrot.slane %v2061_v61, 5 }
  0x1e   : > { %v521_v63 = vrot.slane %v520_v52, 4  ;;  %v2044_v6 = vor.u32 %v2043_v60, %v2040_v59  ;;  %v542_v8 = vshrl.u32 %v498_v56, 16  ;;  %v4154_v9 = vld [vmem:[%s4236_s28 + $0x80] ss:$8 sps:$4 sm:$0xff]   ;;  %v501_v12 = vld [vmem:[%s4236_s28 + $0x1c] sm:$0x1] }
  0x1f   : > { %v535_v5 = vrot.slane %v534_v58, 4  ;;  %v2058_v11 = vor.u32 %v2057_v2, %v2054_v1  ;;  %v545_v13 = vshll.u32 %v498_v56, 16  ;;  %v551_v14 = vshll.u32 %v499_v62, 16  ;;  %v3621_v20 = vld [vmem:[%s4236_s28 + $0x18] sm:$0xf] }
  0x20   : > { %v526_v10 = vsel %vm4303_vm4, %v521_v63, %v525_v44  ;;  %v2045_v16 = vrot.slane %v2044_v6, 4  ;;  %v544_v17 = vrot.slane %v542_v8, 4  ;;  %v559_v29 = vshll.u32 %v500_v3, 16  ;;  %v3623_v31 = vld [vmem:[%s4236_s28 + $0x20] sm:$0xf] }
  0x21   : > { %v540_v15 = vsel %vm4303_vm4, %v535_v5, %v539_v48  ;;  %v2059_v21 = vrot.slane %v2058_v11, 4  ;;  %v565_v30 = vshll.u32 %v501_v12, 16  ;;  %v3624_v34 = vld [vmem:[%s4236_s28 + $0x24] sm:$0x1]  ;;  %v2066_v35 = vshrl.u32 %v3621_v20, 16 }
  0x22   : > { %v2069_v36 = vshll.u32 %v3621_v20, 16  ;;  %v561_v38 = vrot.slane %v559_v29, 5  ;;  %v502_v41 = vld [vmem:[%s4236_s28 + $0x20] sm:$0xf]  ;;  %v2080_v45 = vshrl.u32 %v3623_v31, 16  ;;  %v2083_v49 = vshll.u32 %v3623_v31, 16 }
  0x23   : > { %3847 = vmatmul.mubr.msk.bf16.vlgmr.msra.gmra.mrb[0].mxu1 %vm261_vm1, %v4149_v26  ;;  %v3622_v26 = vld [vmem:[%s4236_s28 + $0x1c] sm:$0x1]  ;;  %v567_v39 = vrot.slane %v565_v30, 5  ;;  %v2068_v43 = vrot.slane %v2066_v35, 4  ;;  %v503_v46 = vld [vmem:[%s4236_s28 + $0x24] sm:$0x1] }
  0x24   : > { %3855 = vmatpush3.bf16.msra.mxu1 %v660_v22  ;;  %3927 = vmatmul.mubr.msk.bf16.vlgmr.msra.gmra.mrb[0].mxu0 %vm261_vm1, %v4150_v27  ;;  %v547_v22 = vrot.slane %v545_v13, 5  ;;  %v2050_v27 = vsel %vm4303_vm4, %v2045_v16, %v2049_v0  ;;  %v2075_v40 = vshll.u32 %v3622_v26, 16  ;;  %v2071_v44 = vrot.slane %v2069_v36, 5  ;;  %v504_v51 = vld [vmem:[%s4236_s28 + $0x28] sm:$0xf] }
  0x25   : > { %3935 = vmatpush3.bf16.msra.mxu0 %v2184_v23  ;;  %3850 = vmatprep.mubr.msk.bf16.mxu1 %vm261_vm1, %v4151_v28  ;;  %v553_v23 = vrot.slane %v551_v14, 5  ;;  %v2089_v50 = vshll.u32 %v3624_v34, 16  ;;  %v2082_v54 = vrot.slane %v2080_v45, 4  ;;  %v570_v55 = vshrl.u32 %v502_v41, 16  ;;  %v505_v60 = vld [vmem:[%s4236_s28 + $0x2c] sm:$0x1] }
  0x26   : > { %3930 = vmatprep.mubr.msk.bf16.mxu0 %vm261_vm1, %v4152_v32  ;;  %4117 = vmatprep.subr.msk.bf16.mxu1 %vm274_vm0, %v3490_v18  ;;  %v556_v18 = vshrl.u32 %v500_v3, 16  ;;  %v2064_v32 = vsel %vm4303_vm4, %v2059_v21, %v2063_v7  ;;  %v548_v33 = vor.u32 %v547_v22, %v544_v17  ;;  %v2077_v48 = vrot.slane %v2075_v40, 5  ;;  %v3625_v2 = vld [vmem:[%s4236_s28 + $0x28] sm:$0xf]  ;;  %v3626_v7 = vld [vmem:[%s4236_s28 + $0x2c] sm:$0x1] }
  0x27   : > { %4125 = vmatprep.subr.msk.bf16.mxu0 %vm274_vm0, %v4268_v19  ;;  %v3466_v19 = vcombine.low %v526_v10, %v540_v15  ;;  %v3634_v37 = vcombine.low %v2050_v27, %v2064_v32  ;;  %v2072_v53 = vor.u32 %v2071_v44, %v2068_v43  ;;  %v2085_v58 = vrot.slane %v2083_v49, 5  ;;  %v3627_v8 = vld [vmem:[%s4236_s28 + $0x30] sm:$0xf]  ;;  %v4348_v17 = vld [vmem:[%s4749_s1 + $0x8] sm:$0x3] }
  0x28   : > { %v558_v28 = vrot.slane %v556_v18, 4  ;;  %v549_v42 = vrot.slane %v548_v33, 4  ;;  %v2091_v59 = vrot.slane %v2089_v50, 5  ;;  %v573_v61 = vshll.u32 %v502_v41, 16  ;;  %v3628_v18 = vld [vmem:[%s4236_s28 + $0x34] sm:$0x1] }
  0x29   : > { %v2073_v62 = vrot.slane %v2072_v53, 4  ;;  %v572_v63 = vrot.slane %v570_v55, 4  ;;  %v579_v0 = vshll.u32 %v503_v46, 16  ;;  %v584_v1 = vshrl.u32 %v504_v51, 16  ;;  %v506_v29 = vld [vmem:[%s4236_s28 + $0x30] sm:$0xf] }
  0x2a   : > { %v562_v47 = vor.u32 %v561_v38, %v558_v28  ;;  %v554_v52 = vsel %vm4303_vm4, %v549_v42, %v553_v23  ;;  %v575_v5 = vrot.slane %v573_v61, 5  ;;  %v587_v6 = vshll.u32 %v504_v51, 16  ;;  %v507_v30 = vld [vmem:[%s4236_s28 + $0x34] sm:$0x1]  ;;  %v508_v35 = vld [vmem:[%s4236_s28 + $0x38] sm:$0xf] }
  0x2b   : > { %3851 = vmatmul.mubr.msk.bf16.gmra.mrb[4].mxu1 %vm261_vm1, %v4153_v4  ;;  %v2086_v4 = vor.u32 %v2085_v58, %v2082_v54  ;;  %v2078_v10 = vsel %vm4303_vm4, %v2073_v62, %v2077_v48  ;;  %v581_v11 = vrot.slane %v579_v0, 5  ;;  %v586_v12 = vrot.slane %v584_v1, 4  ;;  %v509_v42 = vld [vmem:[%s4236_s28 + $0x3c] sm:$0x1]  ;;  %v3629_v49 = vld [vmem:[%s4236_s28 + $0x38] sm:$0xf] }
  0x2c   : > { %3931 = vmatmul.mubr.msk.bf16.gmra.mrb[4].mxu0 %vm261_vm1, %v4154_v9  ;;  %3856 = vmatprep.mubr.msk.bf16.mxu1 %vm261_vm1, %v3466_v19  ;;  %v563_v56 = vrot.slane %v562_v47, 4  ;;  %v576_v14 = vor.u32 %v575_v5, %v572_v63  ;;  %v589_v15 = vrot.slane %v587_v6, 5  ;;  %v593_v16 = vshll.u32 %v505_v60, 16  ;;  %v3630_v54 = vld [vmem:[%s4236_s28 + $0x3c] sm:$0x1] }
  0x2d   : > { %3936 = vmatprep.mubr.msk.bf16.mxu0 %vm261_vm1, %v3634_v37  ;;  %v2087_v13 = vrot.slane %v2086_v4, 4  ;;  %v2094_v20 = vshrl.u32 %v3625_v2, 16  ;;  %v2097_v19 = vshll.u32 %v3625_v2, 16  ;;  %v2103_v21 = vshll.u32 %v3626_v7, 16  ;;  %v3632_v2 = vld [vmem:[%s4236_s28 + $0x44] sm:$0x1] }
  0x2e   : > { %v568_v3 = vsel %vm4303_vm4, %v563_v56, %v567_v39  ;;  %v2108_v22 = vshrl.u32 %v3627_v8, 16  ;;  %v577_v26 = vrot.slane %v576_v14, 4  ;;  %v590_v27 = vor.u32 %v589_v15, %v586_v12  ;;  %v4365_v39 = vld [vmem:[%s4749_s1 + $0x18] sm:$0x3]  ;;  %v3475_v14 = vld [vmem:[%s4236_s28 + $0x4c] sm:$0x1] }
  0x2f   : > { %v3467_v9 = vcombine.low %v554_v52, %v568_v3  ;;  %v2092_v23 = vsel %vm4303_vm4, %v2087_v13, %v2091_v59  ;;  %v595_v28 = vrot.slane %v593_v16, 5  ;;  %v2096_v32 = vrot.slane %v2094_v20, 4  ;;  %v3631_v59 = vld [vmem:[%s4236_s28 + $0x40] sm:$0xf] }
  0x30   : > { %v3635_v31 = vcombine.low %v2078_v10, %v2092_v23  ;;  %v2099_v33 = vrot.slane %v2097_v19, 5  ;;  %v2105_v34 = vrot.slane %v2103_v21, 5  ;;  %v591_v36 = vrot.slane %v590_v27, 4  ;;  %v3476_v19 = vld [vmem:[%s4236_s28 + $0x50] sm:$0xf] }
  0x31   : > { %v2110_v37 = vrot.slane %v2108_v22, 4  ;;  %v2111_v38 = vshll.u32 %v3627_v8, 16  ;;  %v2117_v41 = vshll.u32 %v3628_v18, 16  ;;  %v598_v43 = vshrl.u32 %v506_v29, 16 }
  0x32   : > { %v2100_v40 = vor.u32 %v2099_v33, %v2096_v32  ;;  %v601_v44 = vshll.u32 %v506_v29, 16  ;;  %v596_v45 = vsel %vm4303_vm4, %v591_v36, %v595_v28  ;;  %v607_v47 = vshll.u32 %v507_v30, 16  ;;  %v3477_v29 = vld [vmem:[%s4236_s28 + $0x54] sm:$0x1] }
  0x33   : > { %3857 = vmatmul.mubr.msk.bf16.vlgmr.msra.gmra.mrb[0].mxu1 %vm261_vm1, %v3467_v9  ;;  %v2113_v46 = vrot.slane %v2111_v38, 5  ;;  %v612_v48 = vshrl.u32 %v508_v35, 16  ;;  %v2119_v52 = vrot.slane %v2117_v41, 5  ;;  %v600_v53 = vrot.slane %v598_v43, 4  ;;  %v3474_v9 = vld [vmem:[%s4236_s28 + $0x48] sm:$0xf] }
  0x34   : > { %3865 = vmatpush3.bf16.msra.mxu1 %v4278_v24  ;;  %v582_v24 = vsel %vm4303_vm4, %v577_v26, %v581_v11  ;;  %3937 = vmatmul.mubr.msk.bf16.vlgmr.msra.gmra.mrb[0].mxu0 %vm261_vm1, %v3635_v31  ;;  %v2101_v51 = vrot.slane %v2100_v40, 4  ;;  %v603_v56 = vrot.slane %v601_v44, 5  ;;  %v615_v61 = vshll.u32 %v508_v35, 16  ;;  %v3643_v41 = vld [vmem:[%s4236_s28 + $0x54] sm:$0x1] }
  0x35   : > { %4118 = vmatprep.subr.msk.bf16.mxu1 %vm274_vm0, %v4348_v17  ;;  %3945 = vmatpush3.bf16.msra.mxu0 %v4282_v25  ;;  %v3468_v50 = vcombine.low %v582_v24, %v596_v45  ;;  %v2114_v55 = vor.u32 %v2113_v46, %v2110_v37  ;;  %v609_v25 = vrot.slane %v607_v47, 5  ;;  %v614_v58 = vrot.slane %v612_v48, 4  ;;  %v3642_v24 = vld [vmem:[%s4236_s28 + $0x50] sm:$0xf] }
  0x36   : > { %4126 = vmatprep.subr.msk.bf16.mxu0 %vm274_vm0, %v4365_v39  ;;  %v2106_v60 = vsel %vm4303_vm4, %v2101_v51, %v2105_v34  ;;  %v621_v62 = vshll.u32 %v509_v42, 16  ;;  %v2122_v63 = vshrl.u32 %v3629_v49, 16  ;;  %v604_v1 = vor.u32 %v603_v56, %v600_v53  ;;  %v3644_v42 = vld [vmem:[%s4236_s28 + $0x58] sm:$0xf] }
  0x37   : > { %3860 = vmatprep.mubr.msk.bf16.mxu1 %vm261_vm1, %v3468_v50  ;;  %v2115_v0 = vrot.slane %v2114_v55, 4  ;;  %v2125_v3 = vshll.u32 %v3629_v49, 16  ;;  %v2131_v4 = vshll.u32 %v3630_v54, 16  ;;  %v617_v5 = vrot.slane %v615_v61, 5 }
  0x38   : > { %v623_v6 = vrot.slane %v621_v62, 5  ;;  %v2124_v7 = vrot.slane %v2122_v63, 4  ;;  %v2136_v8 = vshrl.u32 %v3631_v59, 16  ;;  %v605_v11 = vrot.slane %v604_v1, 4  ;;  %v3479_v1 = vld [vmem:[%s4236_s28 + $0x5c] sm:$0x1] }
  0x39   : > { %v2120_v10 = vsel %vm4303_vm4, %v2115_v0, %v2119_v52  ;;  %v2127_v12 = vrot.slane %v2125_v3, 5  ;;  %v2133_v13 = vrot.slane %v2131_v4, 5  ;;  %v618_v16 = vor.u32 %v617_v5, %v614_v58  ;;  %v3645_v52 = vld [vmem:[%s4236_s28 + $0x5c] sm:$0x1] }
  0x3a   : > { %v3636_v15 = vcombine.low %v2106_v60, %v2120_v10  ;;  %v2138_v18 = vrot.slane %v2136_v8, 4  ;;  %v2139_v20 = vshll.u32 %v3631_v59, 16  ;;  %v610_v21 = vsel %vm4303_vm4, %v605_v11, %v609_v25  ;;  %v3478_v60 = vld [vmem:[%s4236_s28 + $0x58] sm:$0xf] }
  0x3b   : > { %v2128_v22 = vor.u32 %v2127_v12, %v2124_v7  ;;  %v2145_v23 = vshll.u32 %v3632_v2, 16  ;;  %v760_v26 = vshrl.u32 %v3474_v9, 16  ;;  %v619_v27 = vrot.slane %v618_v16, 4  ;;  %v3480_v2 = vld [vmem:[%s4236_s28 + $0x60] sm:$0xf] }
  0x3c   : > { %3940 = vmatprep.mubr.msk.bf16.mxu0 %vm261_vm1, %v3636_v15  ;;  %v2141_v28 = vrot.slane %v2139_v20, 5  ;;  %v763_v30 = vshll.u32 %v3474_v9, 16  ;;  %v769_v31 = vshll.u32 %v3475_v14, 16  ;;  %v774_v35 = vshrl.u32 %v3476_v19, 16  ;;  %v3481_v9 = vld [vmem:[%s4236_s28 + $0x64] sm:$0x1] }
  0x3d   : > { %v2129_v32 = vrot.slane %v2128_v22, 4  ;;  %v2147_v33 = vrot.slane %v2145_v23, 5  ;;  %v762_v34 = vrot.slane %v760_v26, 4  ;;  %v624_v36 = vsel %vm4303_vm4, %v619_v27, %v623_v6  ;;  %v3646_v16 = vld [vmem:[%s4236_s28 + $0x60] sm:$0xf] }
  0x3e   : > { %v2142_v37 = vor.u32 %v2141_v28, %v2138_v18  ;;  %v765_v38 = vrot.slane %v763_v30, 5  ;;  %v771_v40 = vrot.slane %v769_v31, 5  ;;  %v3469_v43 = vcombine.low %v610_v21, %v624_v36  ;;  %v3647_v22 = vld [vmem:[%s4236_s28 + $0x64] sm:$0x1] }
  0x3f   : > { %v2134_v44 = vsel %vm4303_vm4, %v2129_v32, %v2133_v13  ;;  %v776_v45 = vrot.slane %v774_v35, 4  ;;  %v777_v46 = vshll.u32 %v3476_v19, 16  ;;  %v783_v49 = vshll.u32 %v3477_v29, 16  ;;  %v3648_v29 = vld [vmem:[%s4236_s28 + $0x68] sm:$0xf] }
  0x40   : > { %v2143_v47 = vrot.slane %v2142_v37, 4  ;;  %v766_v48 = vor.u32 %v765_v38, %v762_v34  ;;  %v2284_v50 = vshrl.u32 %v3642_v24, 16  ;;  %3861 = vmatmul.mubr.msk.bf16.gmra.mrb[4].mxu1 %vm261_vm1, %v3469_v43  ;;  %v2287_v53 = vshll.u32 %v3642_v24, 16  ;;  %v3649_v34 = vld [vmem:[%s4236_s28 + $0x6c] sm:$0x1] }
  0x41   : > { %v779_v51 = vrot.slane %v777_v46, 5  ;;  %v2293_v54 = vshll.u32 %v3643_v41, 16  ;;  %v2298_v55 = vshrl.u32 %v3644_v42, 16  ;;  %v785_v58 = vrot.slane %v783_v49, 5  ;;  %v3482_v38 = vld [vmem:[%s4236_s28 + $0x68] sm:$0xf] }
  0x42   : > { %v2148_v56 = vsel %vm4303_vm4, %v2143_v47, %v2147_v33  ;;  %v767_v25 = vrot.slane %v766_v48, 4  ;;  %v2286_v59 = vrot.slane %v2284_v50, 4  ;;  %v2289_v63 = vrot.slane %v2287_v53, 5  ;;  %v3483_v48 = vld [vmem:[%s4236_s28 + $0x6c] sm:$0x1] }
  0x43   : > { %v3637_v61 = vcombine.low %v2134_v44, %v2148_v56  ;;  %v780_v62 = vor.u32 %v779_v51, %v776_v45  ;;  %v2295_v0 = vrot.slane %v2293_v54, 5  ;;  %v2300_v4 = vrot.slane %v2298_v55, 4  ;;  %v3484_v53 = vld [vmem:[%s4236_s28 + $0x70] sm:$0xf] }
  0x44   : > { %v772_v3 = vsel %vm4303_vm4, %v767_v25, %v771_v40  ;;  %v2301_v5 = vshll.u32 %v3644_v42, 16  ;;  %v2307_v6 = vshll.u32 %v3645_v52, 16  ;;  %v2290_v8 = vor.u32 %v2289_v63, %v2286_v59  ;;  %v3485_v25 = vld [vmem:[%s4236_s28 + $0x74] sm:$0x1] }
  0x45   : > { %3941 = vmatmul.mubr.msk.bf16.gmra.mrb[4].mxu0 %vm261_vm1, %v3637_v61  ;;  %v781_v7 = vrot.slane %v780_v62, 4  ;;  %v788_v10 = vshrl.u32 %v3478_v60, 16  ;;  %v791_v11 = vshll.u32 %v3478_v60, 16  ;;  %v797_v14 = vshll.u32 %v3479_v1, 16  ;;  %v3651_v63 = vld [vmem:[%s4236_s28 + $0x74] sm:$0x1] }
  0x46   : > { %v2303_v12 = vrot.slane %v2301_v5, 5  ;;  %v2309_v13 = vrot.slane %v2307_v6, 5  ;;  %v802_v15 = vshrl.u32 %v3480_v2, 16  ;;  %v2291_v20 = vrot.slane %v2290_v8, 4 }
  0x47   : > { %v786_v18 = vsel %vm4303_vm4, %v781_v7, %v785_v58  ;;  %v790_v19 = vrot.slane %v788_v10, 4  ;;  %v793_v21 = vrot.slane %v791_v11, 5  ;;  %v799_v27 = vrot.slane %v797_v14, 5  ;;  %v3650_v58 = vld [vmem:[%s4236_s28 + $0x70] sm:$0xf] }
  0x48   : > { %v3491_v23 = vcombine.low %v772_v3, %v786_v18  ;;  %v2304_v26 = vor.u32 %v2303_v12, %v2300_v4  ;;  %v804_v28 = vrot.slane %v802_v15, 4  ;;  %v2296_v30 = vsel %vm4303_vm4, %v2291_v20, %v2295_v0  ;;  %v3652_v0 = vld [vmem:[%s4236_s28 + $0x78] sm:$0xf]  ;;  %v4440_v12 = vld [vmem:[%s4749_s1 + $0xa] sm:$0x3] }
  0x49   : > { %v794_v31 = vor.u32 %v793_v21, %v790_v19  ;;  %v805_v32 = vshll.u32 %v3480_v2, 16  ;;  %v811_v33 = vshll.u32 %v3481_v9, 16  ;;  %v2312_v24 = vshrl.u32 %v3646_v16, 16  ;;  %v3486_v20 = vld [vmem:[%s4236_s28 + $0x78] sm:$0xf] }
  0x4a   : > { %3866 = vmatprep.mubr.msk.bf16.mxu1 %vm261_vm1, %v3491_v23  ;;  %v2305_v35 = vrot.slane %v2304_v26, 4  ;;  %v2315_v36 = vshll.u32 %v3646_v16, 16  ;;  %v2321_v37 = vshll.u32 %v3647_v22, 16  ;;  %v1041_v42 = vsel %vm274_vm0, %v4348_v17, 0  ;;  %v3653_v16 = vld [vmem:[%s4236_s28 + $0x7c] sm:$0x1] }
  0x4b   : > { %v795_v40 = vrot.slane %v794_v31, 4  ;;  %v807_v41 = vrot.slane %v805_v32, 5  ;;  %v2326_v43 = vshrl.u32 %v3648_v29, 16  ;;  %v813_v45 = vrot.slane %v811_v33, 5  ;;  %v3488_v26 = vld [vmem:[%s4236_s28 + $0x80] sm:$0xf] }
  0x4c   : > { %v2310_v44 = vsel %vm4303_vm4, %v2305_v35, %v2309_v13  ;;  %v2314_v46 = vrot.slane %v2312_v24, 4  ;;  %v2317_v47 = vrot.slane %v2315_v36, 5  ;;  %v2323_v52 = vrot.slane %v2321_v37, 5  ;;  %v3487_v31 = vld [vmem:[%s4236_s28 + $0x7c] sm:$0x1] }
  0x4d   : > { %v3659_v49 = vcombine.low %v2296_v30, %v2310_v44  ;;  %v800_v50 = vsel %vm4303_vm4, %v795_v40, %v799_v27  ;;  %v808_v51 = vor.u32 %v807_v41, %v804_v28  ;;  %v2328_v54 = vrot.slane %v2326_v43, 4  ;;  %v4454_v40 = vld [vmem:[%s4749_s1 + $0x1a] sm:$0x3]  ;;  %v3489_v43 = vld [vmem:[%s4236_s28 + $0x84] sm:$0x1] }
  0x4e   : > { %v2318_v17 = vor.u32 %v2317_v47, %v2314_v46  ;;  %v2329_v55 = vshll.u32 %v3648_v29, 16  ;;  %v2335_v56 = vshll.u32 %v3649_v34, 16  ;;  %v2565_v60 = vsel %vm274_vm0, %v4365_v39, 0 }
  0x4f   : > { %3946 = vmatprep.mubr.msk.bf16.mxu0 %vm261_vm1, %v3659_v49  ;;  %v809_v59 = vrot.slane %v808_v51, 4  ;;  %v816_v61 = vshrl.u32 %v3482_v38, 16  ;;  %v819_v62 = vshll.u32 %v3482_v38, 16  ;;  %v825_v3 = vshll.u32 %v3483_v48, 16 }
  0x50   : > { %v2319_v1 = vrot.slane %v2318_v17, 4  ;;  %v2331_v2 = vrot.slane %v2329_v55, 5  ;;  %v830_v4 = vshrl.u32 %v3484_v53, 16  ;;  %v2337_v6 = vrot.slane %v2335_v56, 5 }
  0x51   : > { %v814_v5 = vsel %vm4303_vm4, %v809_v59, %v813_v45  ;;  %v818_v7 = vrot.slane %v816_v61, 4  ;;  %v821_v8 = vrot.slane %v819_v62, 5  ;;  %v833_v14 = vshll.u32 %v3484_v53, 16  ;;  %v3656_v59 = vld [vmem:[%s4236_s28 + $0x88] sm:$0xf] }
  0x52   : > { %v3492_v9 = vcombine.low %v800_v50, %v814_v5  ;;  %v2324_v39 = vsel %vm4303_vm4, %v2319_v1, %v2323_v52  ;;  %v2332_v10 = vor.u32 %v2331_v2, %v2328_v54  ;;  %v832_v11 = vrot.slane %v830_v4, 4  ;;  %v3654_v50 = vld [vmem:[%s4236_s28 + $0x80] sm:$0xf]  ;;  %v3655_v54 = vld [vmem:[%s4236_s28 + $0x84] sm:$0x1] }
  0x53   : > { %v822_v13 = vor.u32 %v821_v8, %v818_v7  ;;  %v839_v15 = vshll.u32 %v3485_v25, 16  ;;  %v2340_v18 = vshrl.u32 %v3650_v58, 16  ;;  %v2343_v21 = vshll.u32 %v3650_v58, 16  ;;  %v3657_v7 = vld [vmem:[%s4236_s28 + $0x8c] sm:$0x1] }
  0x54   : > { %3867 = vmatmul.mubr.msk.bf16.vlgmr.msra.gmra.mrb[0].mxu1 %vm261_vm1, %v3492_v9  ;;  %v2333_v19 = vrot.slane %v2332_v10, 4  ;;  %v2349_v22 = vshll.u32 %v3651_v63, 16  ;;  %v2354_v23 = vshrl.u32 %v3652_v0, 16  ;;  %v827_v28 = vrot.slane %v825_v3, 5 }
  0x55   : > { %3875 = vmatpush3.bf16.msra.mxu1 %v1041_v42  ;;  %v823_v27 = vrot.slane %v822_v13, 4  ;;  %v835_v29 = vrot.slane %v833_v14, 5  ;;  %v2342_v30 = vrot.slane %v2340_v18, 4  ;;  %v841_v33 = vrot.slane %v839_v15, 5 }
  0x56   : > { %v2338_v32 = vsel %vm4303_vm4, %v2333_v19, %v2337_v6  ;;  %v2345_v34 = vrot.slane %v2343_v21, 5  ;;  %v2351_v35 = vrot.slane %v2349_v22, 5  ;;  %4119 = vmatprep.subr.msk.bf16.mxu1 %vm274_vm0, %v4440_v12  ;;  %v2356_v37 = vrot.slane %v2354_v23, 4 }
  0x57   : > { %v3660_v24 = vcombine.low %v2324_v39, %v2338_v32  ;;  %v836_v36 = vor.u32 %v835_v29, %v832_v11  ;;  %v2357_v38 = vshll.u32 %v3652_v0, 16  ;;  %v2363_v42 = vshll.u32 %v3653_v16, 16  ;;  %v4155_v29 = vld [vmem:[%s4236_s28 + $0x90] ss:$8 sps:$4 sm:$0xff]  }
  0x58   : > { %v2346_v41 = vor.u32 %v2345_v34, %v2342_v30  ;;  %v844_v44 = vshrl.u32 %v3486_v20, 16  ;;  %v847_v45 = vshll.u32 %v3486_v20, 16  ;;  %v828_v46 = vsel %vm4303_vm4, %v823_v27, %v827_v28 }
  0x59   : > { %3947 = vmatmul.mubr.msk.bf16.vlgmr.msra.gmra.mrb[0].mxu0 %vm261_vm1, %v3660_v24  ;;  %v837_v47 = vrot.slane %v836_v36, 4  ;;  %v2359_v48 = vrot.slane %v2357_v38, 5  ;;  %v858_v49 = vshrl.u32 %v3488_v26, 16  ;;  %v853_v17 = vshll.u32 %v3487_v31, 16  ;;  %v4156_v24 = vld [vmem:[%s4236_s28 + $0x98] ss:$8 sps:$4 sm:$0xff]  }
  0x5a   : > { %3955 = vmatpush3.bf16.msra.mxu0 %v2565_v60  ;;  %v2347_v51 = vrot.slane %v2346_v41, 4  ;;  %v846_v52 = vrot.slane %v844_v44, 4  ;;  %v849_v53 = vrot.slane %v847_v45, 5  ;;  %v2365_v25 = vrot.slane %v2363_v42, 5  ;;  %v4157_v38 = vld [vmem:[%s4236_s28 + $0xa0] ss:$8 sps:$4 sm:$0xff]  }
  0x5b   : > { %v842_v55 = vsel %vm4303_vm4, %v837_v47, %v841_v33  ;;  %v2360_v56 = vor.u32 %v2359_v48, %v2356_v37  ;;  %v860_v58 = vrot.slane %v858_v49, 4  ;;  %4127 = vmatprep.subr.msk.bf16.mxu0 %vm274_vm0, %v4454_v40  ;;  %v861_v63 = vshll.u32 %v3488_v26, 16  ;;  %v3549_v33 = vld [vmem:[%s4749_s1 + $0xc] sm:$0x3]  ;;  %v3534_v45 = vld [vmem:[%s4236_s28 + $0x94] sm:$0x1] }
  0x5c   : > { %v3493_v61 = vcombine.low %v828_v46, %v842_v55  ;;  %v2352_v60 = vsel %vm4303_vm4, %v2347_v51, %v2351_v35  ;;  %v850_v62 = vor.u32 %v849_v53, %v846_v52  ;;  %v867_v1 = vshll.u32 %v3489_v43, 16  ;;  %v3533_v43 = vld [vmem:[%s4236_s28 + $0x90] sm:$0xf]  ;;  %v3535_v46 = vld [vmem:[%s4236_s28 + $0x98] sm:$0xf] }
  0x5d   : > { %v2361_v0 = vrot.slane %v2360_v56, 4  ;;  %v2368_v2 = vshrl.u32 %v3654_v50, 16  ;;  %v2371_v3 = vshll.u32 %v3654_v50, 16  ;;  %v855_v5 = vrot.slane %v853_v17, 5  ;;  %v3536_v47 = vld [vmem:[%s4236_s28 + $0x9c] sm:$0x1] }
  0x5e   : > { %3870 = vmatprep.mubr.msk.bf16.mxu1 %vm261_vm1, %v3493_v61  ;;  %v851_v4 = vrot.slane %v850_v62, 4  ;;  %v863_v6 = vrot.slane %v861_v63, 5  ;;  %v2382_v8 = vshrl.u32 %v3656_v59, 16  ;;  %v2377_v11 = vshll.u32 %v3655_v54, 16  ;;  %v4159_v48 = vld [vmem:[%s4236_s28 + $0xb0] ss:$8 sps:$4 sm:$0xff]  }
  0x5f   : > { %v2366_v9 = vsel %vm4303_vm4, %v2361_v0, %v2365_v25  ;;  %v2370_v39 = vrot.slane %v2368_v2, 4  ;;  %v2373_v10 = vrot.slane %v2371_v3, 5  ;;  %v869_v15 = vrot.slane %v867_v1, 5  ;;  %v3701_v17 = vld [vmem:[%s4236_s28 + $0x98] sm:$0xf] }
  0x60   : > { %v3661_v13 = vcombine.low %v2352_v60, %v2366_v9  ;;  %v864_v14 = vor.u32 %v863_v6, %v860_v58  ;;  %v2384_v18 = vrot.slane %v2382_v8, 4  ;;  %v2385_v20 = vshll.u32 %v3656_v59, 16  ;;  %v3702_v54 = vld [vmem:[%s4236_s28 + $0x9c] sm:$0x1]  ;;  %v3703_v59 = vld [vmem:[%s4236_s28 + $0xa0] sm:$0xf] }
  0x61   : > { %v2374_v16 = vor.u32 %v2373_v10, %v2370_v39  ;;  %v2391_v19 = vshll.u32 %v3657_v7, 16  ;;  %v856_v21 = vsel %vm4303_vm4, %v851_v4, %v855_v5  ;;  %v2379_v26 = vrot.slane %v2377_v11, 5  ;;  %v4158_v61 = vld [vmem:[%s4236_s28 + $0xa8] ss:$8 sps:$4 sm:$0xff]   ;;  %v3704_v63 = vld [vmem:[%s4236_s28 + $0xa4] sm:$0x1] }
  0x62   : > { %3950 = vmatprep.mubr.msk.bf16.mxu0 %vm261_vm1, %v3661_v13  ;;  %v865_v22 = vrot.slane %v864_v14, 4  ;;  %v2387_v27 = vrot.slane %v2385_v20, 5  ;;  %v1176_v36 = vsel %vm274_vm0, %v4440_v12, 0  ;;  %v4494_v41 = vsel %vm274_vm0, %v4454_v40, 0  ;;  %v4508_v40 = vld [vmem:[%s4749_s1 + $0x1c] sm:$0x3] }
  0x63   : > { %v2375_v23 = vrot.slane %v2374_v16, 4  ;;  %v2393_v32 = vrot.slane %v2391_v19, 5  ;;  %v4497_v42 = vsel %vm274_vm0, %v3549_v33, 0  ;;  %v1276_v12 = vshrl.u32 %v3533_v43, 16  ;;  %v4160_v2 = vld [vmem:[%s4236_s28 + $0xb8] ss:$8 sps:$4 sm:$0xff]  }
  0x64   : > { %v870_v28 = vsel %vm4303_vm4, %v865_v22, %v869_v15  ;;  %v2388_v31 = vor.u32 %v2387_v27, %v2384_v18  ;;  %v1279_v49 = vshll.u32 %v3533_v43, 16  ;;  %v1285_v50 = vshll.u32 %v3534_v45, 16  ;;  %v3537_v10 = vld [vmem:[%s4236_s28 + $0xa0] sm:$0xf]  ;;  %v3538_v18 = vld [vmem:[%s4236_s28 + $0xa4] sm:$0x1] }
  0x65   : > { %v3494_v30 = vcombine.low %v856_v21, %v870_v28  ;;  %v2380_v34 = vsel %vm4303_vm4, %v2375_v23, %v2379_v26  ;;  %v1290_v51 = vshrl.u32 %v3535_v46, 16  ;;  %v1293_v52 = vshll.u32 %v3535_v46, 16  ;;  %v4161_v11 = vld [vmem:[%s4236_s28 + $0xc0] ss:$8 sps:$4 sm:$0xff]   ;;  %v4534_v28 = vld [vmem:[%s4749_s1 + $0xe] sm:$0x3] }
  0x66   : > { %v2389_v35 = vrot.slane %v2388_v31, 4  ;;  %v1299_v53 = vshll.u32 %v3536_v47, 16  ;;  %v1278_v55 = vrot.slane %v1276_v12, 4  ;;  %v1281_v56 = vrot.slane %v1279_v49, 5  ;;  %v4163_v20 = vld [vmem:[%s4236_s28 + $0xd8] ss:$8 sps:$4 sm:$0xff]  }
  0x67   : > { %3871 = vmatmul.mubr.msk.bf16.gmra.mrb[4].mxu1 %vm261_vm1, %v3494_v30  ;;  %v1287_v25 = vrot.slane %v1285_v50, 5  ;;  %v1292_v58 = vrot.slane %v1290_v51, 4  ;;  %v1295_v60 = vrot.slane %v1293_v52, 5  ;;  %v2800_v0 = vshrl.u32 %v3701_v17, 16  ;;  %v3539_v26 = vld [vmem:[%s4236_s28 + $0xa8] sm:$0xf] }
  0x68   : > { %3876 = vmatprep.mubr.msk.bf16.mxu1 %vm261_vm1, %v4155_v29  ;;  %v2394_v37 = vsel %vm4303_vm4, %v2389_v35, %v2393_v32  ;;  %v1301_v62 = vrot.slane %v1299_v53, 5  ;;  %v2803_v1 = vshll.u32 %v3701_v17, 16  ;;  %v1282_v3 = vor.u32 %v1281_v56, %v1278_v55  ;;  %v3540_v30 = vld [vmem:[%s4236_s28 + $0xac] sm:$0x1]  ;;  %v4162_v46 = vld [vmem:[%s4236_s28 + $0xc8] ss:$8 sps:$4 sm:$0xff]  }
  0x69   : > { %v3662_v44 = vcombine.low %v2380_v34, %v2394_v37  ;;  %v2809_v4 = vshll.u32 %v3702_v54, 16  ;;  %v2814_v5 = vshrl.u32 %v3703_v59, 16  ;;  %v2817_v6 = vshll.u32 %v3703_v59, 16  ;;  %v3706_v45 = vld [vmem:[%s4236_s28 + $0xac] sm:$0x1] }
  0x6a   : > { %v1296_v7 = vor.u32 %v1295_v60, %v1292_v58  ;;  %v2802_v8 = vrot.slane %v2800_v0, 4  ;;  %v2805_v9 = vrot.slane %v2803_v1, 5  ;;  %v2823_v39 = vshll.u32 %v3704_v63, 16  ;;  %v3707_v49 = vld [vmem:[%s4236_s28 + $0xb0] sm:$0xf] }
  0x6b   : > { %3951 = vmatmul.mubr.msk.bf16.gmra.mrb[4].mxu0 %vm261_vm1, %v3662_v44  ;;  %v4524_v13 = vsel %vm274_vm0, %v4508_v40, 0  ;;  %v1283_v14 = vrot.slane %v1282_v3, 4  ;;  %v2816_v15 = vrot.slane %v2814_v5, 4  ;;  %v2819_v16 = vrot.slane %v2817_v6, 5  ;;  %v4164_v50 = vld [vmem:[%s4236_s28 + $0xe0] ss:$8 sps:$4 sm:$0xff]  }
  0x6c   : > { %3956 = vmatprep.mubr.msk.bf16.mxu0 %vm261_vm1, %v4156_v24  ;;  %v1297_v19 = vrot.slane %v1296_v7, 4  ;;  %v2806_v21 = vor.u32 %v2805_v9, %v2802_v8  ;;  %v2811_v22 = vrot.slane %v2809_v4, 5  ;;  %v2825_v23 = vrot.slane %v2823_v39, 5  ;;  %v3708_v56 = vld [vmem:[%s4236_s28 + $0xb4] sm:$0x1] }
  0x6d   : > { %v1288_v27 = vsel %vm4303_vm4, %v1283_v14, %v1287_v25  ;;  %v2820_v29 = vor.u32 %v2819_v16, %v2816_v15  ;;  %v1304_v31 = vshrl.u32 %v3537_v10, 16  ;;  %v1307_v32 = vshll.u32 %v3537_v10, 16  ;;  %v4165_v59 = vld [vmem:[%s4236_s28 + $0xe8] ss:$8 sps:$4 sm:$0xff]   ;;  %v3542_v5 = vld [vmem:[%s4236_s28 + $0xb4] sm:$0x1] }
  0x6e   : > { %v2807_v34 = vrot.slane %v2806_v21, 4  ;;  %v1313_v35 = vshll.u32 %v3538_v18, 16  ;;  %v1318_v24 = vshrl.u32 %v3539_v26, 16  ;;  %v1327_v53 = vshll.u32 %v3540_v30, 16  ;;  %v3541_v0 = vld [vmem:[%s4236_s28 + $0xb0] sm:$0xf] }
  0x6f   : > { %3877 = vmatmul.mubr.msk.bf16.vlgmr.msra.gmra.mrb[0].mxu1 %vm261_vm1, %v4157_v38  ;;  %v2821_v38 = vrot.slane %v2820_v29, 4  ;;  %v1306_v43 = vrot.slane %v1304_v31, 4  ;;  %v1309_v44 = vrot.slane %v1307_v32, 5  ;;  %v4563_v17 = vsel %vm274_vm0, %v4534_v28, 0  ;;  %v3543_v39 = vld [vmem:[%s4236_s28 + $0xb8] sm:$0xf] }
  0x70   : > { %3885 = vmatpush3.bf16.msra.mxu1 %v1176_v36  ;;  %3880 = vmatprep.mubr.msk.bf16.mxu1 %vm261_vm1, %v4159_v48  ;;  %v3705_v36 = vld [vmem:[%s4236_s28 + $0xa8] sm:$0xf]  ;;  %v2812_v47 = vsel %vm4303_vm4, %v2807_v34, %v2811_v22  ;;  %v1315_v48 = vrot.slane %v1313_v35, 5  ;;  %v1320_v12 = vrot.slane %v1318_v24, 4  ;;  %v1329_v60 = vrot.slane %v1327_v53, 5 }
  0x71   : > { %4120 = vmatprep.subr.msk.bf16.mxu1 %vm274_vm0, %v3549_v33  ;;  %v1302_v33 = vsel %vm4303_vm4, %v1297_v19, %v1301_v62  ;;  %v2826_v51 = vsel %vm4303_vm4, %v2821_v38, %v2825_v23  ;;  %v1310_v52 = vor.u32 %v1309_v44, %v1306_v43  ;;  %v2828_v25 = vshrl.u32 %v3705_v36, 16  ;;  %v4167_v10 = vld [vmem:[%s4236_s28 + $0xf8] ss:$8 sps:$4 sm:$0xff]   ;;  %v3710_v32 = vld [vmem:[%s4236_s28 + $0xbc] sm:$0x1] }
  0x72   : > { %v4543_v37 = vcombine.low %v1288_v27, %v1302_v33  ;;  %v4566_v54 = vcombine.low %v2812_v47, %v2826_v51  ;;  %v2831_v58 = vshll.u32 %v3705_v36, 16  ;;  %v2837_v62 = vshll.u32 %v3706_v45, 16  ;;  %v4166_v23 = vld [vmem:[%s4236_s28 + $0xf0] ss:$8 sps:$4 sm:$0xff]   ;;  %v3711_v36 = vld [vmem:[%s4236_s28 + $0xc0] sm:$0xf] }
  0x73   : > { %3957 = vmatmul.mubr.msk.bf16.vlgmr.msra.gmra.mrb[0].mxu0 %vm261_vm1, %v4158_v61  ;;  %v1311_v61 = vrot.slane %v1310_v52, 4  ;;  %v2842_v63 = vshrl.u32 %v3707_v49, 16  ;;  %v2845_v4 = vshll.u32 %v3707_v49, 16  ;;  %v2851_v9 = vshll.u32 %v3708_v56, 16  ;;  %v3709_v31 = vld [vmem:[%s4236_s28 + $0xb8] sm:$0xf] }
  0x74   : > { %3965 = vmatpush3.bf16.msra.mxu0 %v4494_v41  ;;  %3960 = vmatprep.mubr.msk.bf16.mxu0 %vm261_vm1, %v4160_v2  ;;  %v1321_v41 = vshll.u32 %v3539_v26, 16  ;;  %v2830_v2 = vrot.slane %v2828_v25, 4  ;;  %v2833_v3 = vrot.slane %v2831_v58, 5  ;;  %v2839_v7 = vrot.slane %v2837_v62, 5  ;;  %v4168_v38 = vld [vmem:[%s4236_s28 + $0x100] ss:$8 sps:$4 sm:$0xff]  }
  0x75   : > { %4128 = vmatprep.subr.msk.bf16.mxu0 %vm274_vm0, %v4508_v40  ;;  %v4559_v40 = vld [vmem:[%s4749_s1 + $0x1e] sm:$0x3]  ;;  %v1316_v6 = vsel %vm4303_vm4, %v1311_v61, %v1315_v48  ;;  %v2844_v8 = vrot.slane %v2842_v63, 4  ;;  %v2847_v15 = vrot.slane %v2845_v4, 5  ;;  %v2853_v18 = vrot.slane %v2851_v9, 5 }
  0x76   : > { %v1323_v55 = vrot.slane %v1321_v41, 5  ;;  %v2834_v14 = vor.u32 %v2833_v3, %v2830_v2  ;;  %v4579_v16 = vsel %vm274_vm0, %v4559_v40, 0  ;;  %v1332_v19 = vshrl.u32 %v3541_v0, 16  ;;  %v4169_v47 = vld [vmem:[%s4236_s28 + $0x108] ss:$8 sps:$4 sm:$0xff]  }
  0x77   : > { %3881 = vmatmul.mubr.msk.bf16.gmra.mrb[4].mxu1 %vm261_vm1, %v4161_v11  ;;  %v1335_v21 = vshll.u32 %v3541_v0, 16  ;;  %v1341_v22 = vshll.u32 %v3542_v5, 16  ;;  %v2848_v29 = vor.u32 %v2847_v15, %v2844_v8  ;;  %v1346_v30 = vshrl.u32 %v3543_v39, 16  ;;  %v3712_v41 = vld [vmem:[%s4236_s28 + $0xc4] sm:$0x1] }
  0x78   : > { %3886 = vmatprep.mubr.msk.bf16.mxu1 %vm261_vm1, %v4163_v20  ;;  %v1324_v1 = vor.u32 %v1323_v55, %v1320_v12  ;;  %v3544_v20 = vld [vmem:[%s4236_s28 + $0xbc] sm:$0x1]  ;;  %v2835_v27 = vrot.slane %v2834_v14, 4  ;;  %v1334_v34 = vrot.slane %v1332_v19, 4  ;;  %v2856_v49 = vshrl.u32 %v3709_v31, 16 }
  0x79   : > { %v1337_v35 = vrot.slane %v1335_v21, 5  ;;  %v1343_v24 = vrot.slane %v1341_v22, 5  ;;  %v2849_v44 = vrot.slane %v2848_v29, 4  ;;  %v1348_v45 = vrot.slane %v1346_v30, 4  ;;  %v3545_v55 = vld [vmem:[%s4236_s28 + $0xc0] sm:$0xf] }
  0x7a   : > { %v1325_v11 = vrot.slane %v1324_v1, 4  ;;  %v2840_v43 = vsel %vm4303_vm4, %v2835_v27, %v2839_v7  ;;  %v1355_v12 = vshll.u32 %v3544_v20, 16  ;;  %v2865_v52 = vshll.u32 %v3710_v32, 16  ;;  %v3547_v0 = vld [vmem:[%s4236_s28 + $0xc8] sm:$0xf] }
  0x7b   : > { %3961 = vmatmul.mubr.msk.bf16.gmra.mrb[4].mxu0 %vm261_vm1, %v4162_v46  ;;  %v1349_v46 = vshll.u32 %v3543_v39, 16  ;;  %v1338_v48 = vor.u32 %v1337_v35, %v1334_v34  ;;  %v2870_v53 = vshrl.u32 %v3711_v36, 16  ;;  %v2873_v2 = vshll.u32 %v3711_v36, 16  ;;  %v4170_v5 = vld [vmem:[%s4236_s28 + $0x110] ss:$8 sps:$4 sm:$0xff]  }
  0x7c   : > { %3966 = vmatprep.mubr.msk.bf16.mxu0 %vm261_vm1, %v4164_v50  ;;  %v1330_v26 = vsel %vm4303_vm4, %v1325_v11, %v1329_v60  ;;  %v2854_v50 = vsel %vm4303_vm4, %v2849_v44, %v2853_v18  ;;  %v1357_v58 = vrot.slane %v1355_v12, 5  ;;  %v2867_v62 = vrot.slane %v2865_v52, 5  ;;  %v3548_v8 = vld [vmem:[%s4236_s28 + $0xcc] sm:$0x1]  ;;  %v3713_v15 = vld [vmem:[%s4236_s28 + $0xc8] sm:$0xf] }
  0x7d   : > { %v4589_v33 = vcombine.low %v1316_v6, %v1330_v26  ;;  %v1351_v51 = vrot.slane %v1349_v46, 5  ;;  %v4604_v56 = vcombine.low %v2840_v43, %v2854_v50  ;;  %v1339_v25 = vrot.slane %v1338_v48, 4  ;;  %v3714_v21 = vld [vmem:[%s4236_s28 + $0xcc] sm:$0x1]  ;;  %v3715_v29 = vld [vmem:[%s4236_s28 + $0xd0] sm:$0xf] }
  0x7e   : > { %v2872_v63 = vrot.slane %v2870_v53, 4  ;;  %v2879_v3 = vshll.u32 %v3712_v41, 16  ;;  %v1360_v4 = vshrl.u32 %v3545_v55, 16  ;;  %v1363_v9 = vshll.u32 %v3545_v55, 16  ;;  %v3560_v50 = vld [vmem:[%s4236_s28 + $0xe0] sm:$0xf] }
  0x7f   : > { %3887 = vmatmul.mubr.msk.bf16.vlgmr.msra.gmra.mrb[0].mxu1 %vm261_vm1, %v4165_v59  ;;  %v2858_v59 = vrot.slane %v2856_v49, 4  ;;  %v1352_v61 = vor.u32 %v1351_v51, %v1348_v45  ;;  %v1344_v1 = vsel %vm4303_vm4, %v1339_v25, %v1343_v24  ;;  %v1374_v14 = vshrl.u32 %v3547_v0, 16  ;;  %v3716_v24 = vld [vmem:[%s4236_s28 + $0xd4] sm:$0x1] }
  0x80   : > { %3895 = vmatpush3.bf16.msra.mxu1 %v4497_v42  ;;  %3890 = vmatprep.mubr.msk.bf16.mxu1 %vm261_vm1, %v4167_v10  ;;  %v2859_v42 = vshll.u32 %v3709_v31, 16  ;;  %v2881_v10 = vrot.slane %v2879_v3, 5  ;;  %v1362_v11 = vrot.slane %v1360_v4, 4  ;;  %v1365_v20 = vrot.slane %v1363_v9, 5  ;;  %v3726_v3 = vld [vmem:[%s4236_s28 + $0xe0] sm:$0xf] }
  0x81   : > { %4121 = vmatprep.subr.msk.bf16.mxu1 %vm274_vm0, %v4534_v28  ;;  %v3546_v28 = vld [vmem:[%s4236_s28 + $0xc4] sm:$0x1]  ;;  %v1353_v6 = vrot.slane %v1352_v61, 4  ;;  %v1376_v26 = vrot.slane %v1374_v14, 4  ;;  %v1377_v27 = vshll.u32 %v3547_v0, 16  ;;  %v1383_v32 = vshll.u32 %v3548_v8, 16 }
  0x82   : > { %v2861_v60 = vrot.slane %v2859_v42, 5  ;;  %v1369_v39 = vshll.u32 %v3546_v28, 16  ;;  %v1366_v31 = vor.u32 %v1365_v20, %v1362_v11  ;;  %v2887_v36 = vshll.u32 %v3713_v15, 16  ;;  %v3559_v42 = vld [vmem:[%s4236_s28 + $0xdc] sm:$0x1] }
  0x83   : > { %3967 = vmatmul.mubr.msk.bf16.vlgmr.msra.gmra.mrb[0].mxu0 %vm261_vm1, %v4166_v23  ;;  %v1379_v35 = vrot.slane %v1377_v27, 5  ;;  %v1385_v44 = vrot.slane %v1383_v32, 5  ;;  %v2898_v46 = vshrl.u32 %v3715_v29, 16  ;;  %v2901_v55 = vshll.u32 %v3715_v29, 16  ;;  %v3561_v61 = vld [vmem:[%s4236_s28 + $0xe4] sm:$0x1] }
  0x84   : > { %3975 = vmatpush3.bf16.msra.mxu0 %v4524_v13  ;;  %3970 = vmatprep.mubr.msk.bf16.mxu0 %vm261_vm1, %v4168_v38  ;;  %v2862_v7 = vor.u32 %v2861_v60, %v2858_v59  ;;  %v2875_v13 = vrot.slane %v2873_v2, 5  ;;  %v1371_v19 = vrot.slane %v1369_v39, 5  ;;  %v2893_v38 = vshll.u32 %v3714_v21, 16  ;;  %v3728_v8 = vld [vmem:[%s4236_s28 + $0xe8] sm:$0xf] }
  0x85   : > { %4129 = vmatprep.subr.msk.bf16.mxu0 %vm274_vm0, %v4559_v40  ;;  %v1358_v40 = vsel %vm4303_vm4, %v1353_v6, %v1357_v58  ;;  %v1367_v43 = vrot.slane %v1366_v31, 4  ;;  %v1380_v12 = vor.u32 %v1379_v35, %v1376_v26  ;;  %v2889_v41 = vrot.slane %v2887_v36, 5 }
  0x86   : > { %v2863_v18 = vrot.slane %v2862_v7, 4  ;;  %v3552_v22 = vcombine.low %v1344_v1, %v1358_v40  ;;  %v2876_v23 = vor.u32 %v2875_v13, %v2872_v63  ;;  %v2895_v49 = vrot.slane %v2893_v38, 5  ;;  %v3727_v7 = vld [vmem:[%s4236_s28 + $0xe4] sm:$0x1] }
  0x87   : > { %3891 = vmatmul.mubr.msk.bf16.gmra.mrb[4].mxu1 %vm261_vm1, %v4169_v47  ;;  %v3558_v47 = vld [vmem:[%s4236_s28 + $0xd8] sm:$0xf]  ;;  %v1372_v52 = vsel %vm4303_vm4, %v1367_v43, %v1371_v19  ;;  %v2900_v53 = vrot.slane %v2898_v46, 4  ;;  %v2907_v58 = vshll.u32 %v3716_v24, 16  ;;  %v2903_v28 = vrot.slane %v2901_v55, 5 }
  0x88   : > { %3896 = vmatprep.mubr.msk.bf16.mxu1 %vm261_vm1, %v4543_v37  ;;  %v2868_v30 = vsel %vm4303_vm4, %v2863_v18, %v2867_v62  ;;  %v2884_v37 = vshrl.u32 %v3713_v15, 16  ;;  %v2877_v34 = vrot.slane %v2876_v23, 4  ;;  %v1522_v59 = vshrl.u32 %v3558_v47, 16  ;;  %v3729_v15 = vld [vmem:[%s4236_s28 + $0xec] sm:$0x1] }
  0x89   : > { %v1525_v60 = vshll.u32 %v3558_v47, 16  ;;  %v1531_v62 = vshll.u32 %v3559_v42, 16  ;;  %v1536_v63 = vshrl.u32 %v3560_v50, 16  ;;  %v2909_v1 = vrot.slane %v2907_v58, 5  ;;  %v3562_v23 = vld [vmem:[%s4236_s28 + $0xe8] sm:$0xf] }
  0x8a   : > { %v2886_v45 = vrot.slane %v2884_v37, 4  ;;  %v2882_v48 = vsel %vm4303_vm4, %v2877_v34, %v2881_v10  ;;  %v1524_v2 = vrot.slane %v1522_v59, 4  ;;  %v1539_v13 = vshll.u32 %v3560_v50, 16  ;;  %v3564_v34 = vld [vmem:[%s4236_s28 + $0xf0] sm:$0xf] }
  0x8b   : > { %3971 = vmatmul.mubr.msk.bf16.gmra.mrb[4].mxu0 %vm261_vm1, %v4170_v5  ;;  %v3720_v51 = vcombine.low %v2868_v30, %v2882_v48  ;;  %v2904_v5 = vor.u32 %v2903_v28, %v2900_v53  ;;  %v1533_v6 = vrot.slane %v1531_v62, 5  ;;  %v1538_v39 = vrot.slane %v1536_v63, 4  ;;  %v3563_v30 = vld [vmem:[%s4236_s28 + $0xec] sm:$0x1]  ;;  %v3565_v43 = vld [vmem:[%s4236_s28 + $0xf4] sm:$0x1] }
  0x8c   : > { %3976 = vmatprep.mubr.msk.bf16.mxu0 %vm261_vm1, %v4566_v54  ;;  %v1381_v54 = vrot.slane %v1380_v12, 4  ;;  %v2890_v25 = vor.u32 %v2889_v41, %v2886_v45  ;;  %v1545_v10 = vshll.u32 %v3561_v61, 16  ;;  %v3046_v40 = vshrl.u32 %v3726_v3, 16  ;;  %v3730_v48 = vld [vmem:[%s4236_s28 + $0xf0] sm:$0xf] }
  0x8d   : > { %v2905_v11 = vrot.slane %v2904_v5, 4  ;;  %v3049_v18 = vshll.u32 %v3726_v3, 16  ;;  %v1541_v20 = vrot.slane %v1539_v13, 5  ;;  %v3055_v21 = vshll.u32 %v3727_v7, 16  ;;  %v3731_v50 = vld [vmem:[%s4236_s28 + $0xf4] sm:$0x1] }
  0x8e   : > { %v1386_v0 = vsel %vm4303_vm4, %v1381_v54, %v1385_v44  ;;  %v1547_v19 = vrot.slane %v1545_v10, 5  ;;  %v3048_v27 = vrot.slane %v3046_v40, 4  ;;  %v3063_v36 = vshll.u32 %v3728_v8, 16  ;;  %v3732_v54 = vld [vmem:[%s4236_s28 + $0xf8] sm:$0xf] }
  0x8f   : > { %3897 = vmatmul.mubr.msk.bf16.vlgmr.msra.gmra.mrb[0].mxu1 %vm261_vm1, %v4589_v33  ;;  %v2891_v33 = vrot.slane %v2890_v25, 4  ;;  %v3553_v4 = vcombine.low %v1372_v52, %v1386_v0  ;;  %v3051_v29 = vrot.slane %v3049_v18, 5  ;;  %v1542_v31 = vor.u32 %v1541_v20, %v1538_v39  ;;  %v3733_v63 = vld [vmem:[%s4236_s28 + $0xfc] sm:$0x1] }
  0x90   : > { %3905 = vmatpush3.bf16.msra.mxu1 %v4563_v17  ;;  %3900 = vmatprep.mubr.msk.bf16.mxu1 %vm261_vm1, %v3552_v22  ;;  %v1527_v17 = vrot.slane %v1525_v60, 5  ;;  %v3060_v22 = vshrl.u32 %v3728_v8, 16  ;;  %v3057_v32 = vrot.slane %v3055_v21, 5  ;;  %v3069_v38 = vshll.u32 %v3729_v15, 16  ;;  %v3567_v8 = vld [vmem:[%s4236_s28 + $0xfc] sm:$0x1] }
  0x91   : > { %v2896_v9 = vsel %vm4303_vm4, %v2891_v33, %v2895_v49  ;;  %v3052_v24 = vor.u32 %v3051_v29, %v3048_v27  ;;  %v1543_v44 = vrot.slane %v1542_v31, 4  ;;  %v1550_v45 = vshrl.u32 %v3562_v23, 16 }
  0x92   : > { %v1528_v14 = vor.u32 %v1527_v17, %v1524_v2  ;;  %v3062_v37 = vrot.slane %v3060_v22, 4  ;;  %v1553_v46 = vshll.u32 %v3562_v23, 16  ;;  %v1559_v47 = vshll.u32 %v3563_v30, 16 }
  0x93   : > { %3977 = vmatmul.mubr.msk.bf16.vlgmr.msra.gmra.mrb[0].mxu0 %vm261_vm1, %v4604_v56  ;;  %v2910_v56 = vsel %vm4303_vm4, %v2905_v11, %v2909_v1  ;;  %v3053_v12 = vrot.slane %v3052_v24, 4  ;;  %v3065_v41 = vrot.slane %v3063_v36, 5  ;;  %v3071_v49 = vrot.slane %v3069_v38, 5  ;;  %v3568_v11 = vld [vmem:[%s4236_s28 + $0x100] sm:$0xf] }
  0x94   : > { %3985 = vmatpush3.bf16.msra.mxu0 %v4579_v16  ;;  %3980 = vmatprep.mubr.msk.bf16.mxu0 %vm261_vm1, %v3720_v51  ;;  %v1529_v26 = vrot.slane %v1528_v14, 4  ;;  %v3721_v16 = vcombine.low %v2896_v9, %v2910_v56  ;;  %v1564_v42 = vshrl.u32 %v3564_v34, 16  ;;  %v1548_v51 = vsel %vm4303_vm4, %v1543_v44, %v1547_v19  ;;  %v3736_v38 = vld [vmem:[%s4236_s28 + $0x108] sm:$0xf] }
  0x95   : > { %v1552_v52 = vrot.slane %v1550_v45, 4  ;;  %v1555_v53 = vrot.slane %v1553_v46, 5  ;;  %v1561_v55 = vrot.slane %v1559_v47, 5  ;;  %v3058_v58 = vsel %vm4303_vm4, %v3053_v12, %v3057_v32  ;;  %v3735_v47 = vld [vmem:[%s4236_s28 + $0x104] sm:$0x1] }
  0x96   : > { %v1534_v35 = vsel %vm4303_vm4, %v1529_v26, %v1533_v6  ;;  %v3066_v59 = vor.u32 %v3065_v41, %v3062_v37  ;;  %v1566_v28 = vrot.slane %v1564_v42, 4  ;;  %v1567_v60 = vshll.u32 %v3564_v34, 16  ;;  %v3569_v26 = vld [vmem:[%s4236_s28 + $0x104] sm:$0x1]  ;;  %v3734_v37 = vld [vmem:[%s4236_s28 + $0x100] sm:$0xf] }
  0x97   : > { %3901 = vmatmul.mubr.msk.bf16.gmra.mrb[4].mxu1 %vm261_vm1, %v3553_v4  ;;  %v3575_v25 = vcombine.low %v1534_v35, %v1548_v51  ;;  %v1556_v61 = vor.u32 %v1555_v53, %v1552_v52  ;;  %v1573_v62 = vshll.u32 %v3565_v43, 16  ;;  %v3074_v0 = vshrl.u32 %v3730_v48, 16  ;;  %v3566_v4 = vld [vmem:[%s4236_s28 + $0xf8] sm:$0xf]  ;;  %v3737_v41 = vld [vmem:[%s4236_s28 + $0x10c] sm:$0x1] }
  0x98   : > { %v3067_v33 = vrot.slane %v3066_v59, 4  ;;  %v3077_v1 = vshll.u32 %v3730_v48, 16  ;;  %v3083_v2 = vshll.u32 %v3731_v50, 16  ;;  %v3088_v3 = vshrl.u32 %v3732_v54, 16  ;;  %v3570_v53 = vld [vmem:[%s4236_s28 + $0x108] sm:$0xf] }
  0x99   : > { %3906 = vmatprep.mubr.msk.bf16.mxu1 %vm261_vm1, %v3575_v25  ;;  %v1557_v5 = vrot.slane %v1556_v61, 4  ;;  %v1569_v17 = vrot.slane %v1567_v60, 5  ;;  %v1575_v6 = vrot.slane %v1573_v62, 5  ;;  %v3076_v7 = vrot.slane %v3074_v0, 4  ;;  %v3571_v59 = vld [vmem:[%s4236_s28 + $0x10c] sm:$0x1] }
  0x9a   : > { %v3072_v9 = vsel %vm4303_vm4, %v3067_v33, %v3071_v49  ;;  %v3079_v39 = vrot.slane %v3077_v1, 5  ;;  %v3085_v13 = vrot.slane %v3083_v2, 5  ;;  %v3090_v10 = vrot.slane %v3088_v3, 4 }
  0x9b   : > { %3981 = vmatmul.mubr.msk.bf16.gmra.mrb[4].mxu0 %vm261_vm1, %v3721_v16  ;;  %v3743_v14 = vcombine.low %v3058_v58, %v3072_v9  ;;  %v1562_v15 = vsel %vm4303_vm4, %v1557_v5, %v1561_v55  ;;  %v1570_v40 = vor.u32 %v1569_v17, %v1566_v28  ;;  %v3091_v18 = vshll.u32 %v3732_v54, 16 }
  0x9c   : > { %v3080_v20 = vor.u32 %v3079_v39, %v3076_v7  ;;  %v3097_v19 = vshll.u32 %v3733_v63, 16  ;;  %v1578_v21 = vshrl.u32 %v3566_v4, 16  ;;  %v1581_v22 = vshll.u32 %v3566_v4, 16  ;;  %v3572_v63 = vld [vmem:[%s4236_s28 + $0x110] sm:$0xf] }
  0x9d   : > { %3986 = vmatprep.mubr.msk.bf16.mxu0 %vm261_vm1, %v3743_v14  ;;  %v1571_v23 = vrot.slane %v1570_v40, 4  ;;  %v3093_v56 = vrot.slane %v3091_v18, 5  ;;  %v1587_v27 = vshll.u32 %v3567_v8, 16  ;;  %v1592_v29 = vshrl.u32 %v3568_v11, 16  ;;  %v3573_v4 = vld [vmem:[%s4236_s28 + $0x114] sm:$0x1] }
  0x9e   : > { %v3081_v30 = vrot.slane %v3080_v20, 4  ;;  %v3099_v16 = vrot.slane %v3097_v19, 5  ;;  %v1580_v31 = vrot.slane %v1578_v21, 4  ;;  %v1583_v32 = vrot.slane %v1581_v22, 5  ;;  %v3740_v40 = vld [vmem:[%s4236_s28 + $0x118] sm:$0xf] }
  0x9f   : > { %v1576_v34 = vsel %vm4303_vm4, %v1571_v23, %v1575_v6  ;;  %v3094_v35 = vor.u32 %v3093_v56, %v3090_v10  ;;  %v1589_v24 = vrot.slane %v1587_v27, 5  ;;  %v1594_v36 = vrot.slane %v1592_v29, 4  ;;  %v3739_v22 = vld [vmem:[%s4236_s28 + $0x114] sm:$0x1] }
  0xa0   : > { %v3576_v43 = vcombine.low %v1562_v15, %v1576_v34  ;;  %v3086_v44 = vsel %vm4303_vm4, %v3081_v30, %v3085_v13  ;;  %v1584_v45 = vor.u32 %v1583_v32, %v1580_v31  ;;  %v1595_v46 = vshll.u32 %v3568_v11, 16  ;;  %v3738_v13 = vld [vmem:[%s4236_s28 + $0x110] sm:$0xf]  ;;  %v3741_v34 = vld [vmem:[%s4236_s28 + $0x11c] sm:$0x1]  ;;  %s3753_s28 = sshll.u32 %s4756_s16, 6 }
  0xa1   : > { %v3095_v48 = vrot.slane %v3094_v35, 4  ;;  %v1601_v12 = vshll.u32 %v3569_v26, 16  ;;  %v3102_v49 = vshrl.u32 %v3734_v37, 16  ;;  %v3105_v42 = vshll.u32 %v3734_v37, 16  ;;  %s4727_s6 = scalar_lea.vmem %s4750_s2, %s3753_s28 }
  0xa2   : > { %3907 = vmatmul.mubr.msk.bf16.vlgmr.msra.gmra.mrb[0].mxu1 %vm261_vm1, %v3576_v43  ;;  %v1585_v50 = vrot.slane %v1584_v45, 4  ;;  %v1597_v51 = vrot.slane %v1595_v46, 5  ;;  %v3116_v52 = vshrl.u32 %v3736_v38, 16  ;;  %v3111_v58 = vshll.u32 %v3735_v47, 16 }
  0xa3   : > { %v3100_v55 = vsel %vm4303_vm4, %v3095_v48, %v3099_v16  ;;  %v3104_v54 = vrot.slane %v3102_v49, 4  ;;  %v3107_v25 = vrot.slane %v3105_v42, 5  ;;  %v1603_v62 = vrot.slane %v1601_v12, 5 }
  0xa4   : > { %v3744_v28 = vcombine.low %v3086_v44, %v3100_v55  ;;  %v1590_v61 = vsel %vm4303_vm4, %v1585_v50, %v1589_v24  ;;  %v1598_v60 = vor.u32 %v1597_v51, %v1594_v36  ;;  %v3118_v33 = vrot.slane %v3116_v52, 4 }
  0xa5   : > { %v3108_v0 = vor.u32 %v3107_v25, %v3104_v54  ;;  %v3119_v1 = vshll.u32 %v3736_v38, 16  ;;  %v3125_v2 = vshll.u32 %v3737_v41, 16  ;;  %v1606_v5 = vshrl.u32 %v3570_v53, 16 }
  0xa6   : > { %3987 = vmatmul.mubr.msk.bf16.vlgmr.msra.gmra.mrb[0].mxu0 %vm261_vm1, %v3744_v28  ;;  %v1599_v3 = vrot.slane %v1598_v60, 4  ;;  %v1609_v17 = vshll.u32 %v3570_v53, 16  ;;  %v1615_v6 = vshll.u32 %v3571_v59, 16  ;;  %v3113_v8 = vrot.slane %v3111_v58, 5 }
  0xa7   : > { %v3109_v7 = vrot.slane %v3108_v0, 4  ;;  %v3121_v9 = vrot.slane %v3119_v1, 5  ;;  %v1620_v39 = vshrl.u32 %v3572_v63, 16  ;;  %v3127_v11 = vrot.slane %v3125_v2, 5 }
  0xa8   : > { %v1604_v10 = vsel %vm4303_vm4, %v1599_v3, %v1603_v62  ;;  %v1608_v14 = vrot.slane %v1606_v5, 4  ;;  %v1611_v15 = vrot.slane %v1609_v17, 5  ;;  %v1617_v19 = vrot.slane %v1615_v6, 5 }
  0xa9   : > { %v3577_v18 = vcombine.low %v1590_v61, %v1604_v10  ;;  %v3122_v20 = vor.u32 %v3121_v9, %v3118_v33  ;;  %v1622_v21 = vrot.slane %v1620_v39, 4  ;;  %v1623_v56 = vshll.u32 %v3572_v63, 16 }
  0xaa   : > { %v1612_v23 = vor.u32 %v1611_v15, %v1608_v14  ;;  %v1629_v26 = vshll.u32 %v3573_v4, 16  ;;  %v3130_v27 = vshrl.u32 %v3738_v13, 16  ;;  %v3114_v29 = vsel %vm4303_vm4, %v3109_v7, %v3113_v8 }
  0xab   : > { %3910 = vmatprep.mubr.msk.bf16.mxu1 %vm261_vm1, %v3577_v18  ;;  %v3123_v30 = vrot.slane %v3122_v20, 4  ;;  %v3133_v16 = vshll.u32 %v3738_v13, 16  ;;  %v3144_v31 = vshrl.u32 %v3740_v40, 16  ;;  %v1625_v37 = vrot.slane %v1623_v56, 5 }
  0xac   : > { %v1613_v32 = vrot.slane %v1612_v23, 4  ;;  %v3132_v35 = vrot.slane %v3130_v27, 4  ;;  %v3139_v24 = vshll.u32 %v3739_v22, 16  ;;  %v1631_v38 = vrot.slane %v1629_v26, 5 }
  0xad   : > { %v3128_v36 = vsel %vm4303_vm4, %v3123_v30, %v3127_v11  ;;  %v3135_v43 = vrot.slane %v3133_v16, 5  ;;  %v1626_v45 = vor.u32 %v1625_v37, %v1622_v21  ;;  %v3146_v46 = vrot.slane %v3144_v31, 4 }
  0xae   : > { %v3745_v44 = vcombine.low %v3114_v29, %v3128_v36  ;;  %v3147_v47 = vshll.u32 %v3740_v40, 16  ;;  %v3153_v12 = vshll.u32 %v3741_v34, 16  ;;  %v1618_v41 = vsel %vm4303_vm4, %v1613_v32, %v1617_v19 }
  0xaf   : > { %v3136_v48 = vor.u32 %v3135_v43, %v3132_v35  ;;  %v1627_v49 = vrot.slane %v1626_v45, 4  ;;  %v3141_v42 = vrot.slane %v3139_v24, 5 }
  0xb0   : > { %3990 = vmatprep.mubr.msk.bf16.mxu0 %vm261_vm1, %v3745_v44  ;;  %v3149_v50 = vrot.slane %v3147_v47, 5  ;;  %v3155_v55 = vrot.slane %v3153_v12, 5 }
  0xb1   : > { %v3137_v51 = vrot.slane %v3136_v48, 4  ;;  %v1632_v52 = vsel %vm4303_vm4, %v1627_v49, %v1631_v38 }
  0xb2   : > { %v3150_v53 = vor.u32 %v3149_v50, %v3146_v46  ;;  %v3578_v54 = vcombine.low %v1618_v41, %v1632_v52 }
  0xb3   : > { %v3142_v25 = vsel %vm4303_vm4, %v3137_v51, %v3141_v42 }
  0xb4   : > { %v3151_v58 = vrot.slane %v3150_v53, 4  ;;  %3911 = vmatmul.mubr.msk.bf16.gmra.mrb[4].mxu1 %vm261_vm1, %v3578_v54 }
  0xb6   : > { %v3156_v59 = vsel %vm4303_vm4, %v3151_v58, %v3155_v55 }
  0xb7   : > { %v3746_v28 = vcombine.low %v3142_v25, %v3156_v59 }
  0xb9   : > { %3991 = vmatmul.mubr.msk.bf16.gmra.mrb[4].mxu0 %vm261_vm1, %v3746_v28 }
 0x175   : > { %v3908_v61 = vpop.f32.mrb[0].mxu1 }
 0x176   : > { %v1704_v60 = vpop.f32.mrb[1].mxu1 }
 0x177   : > { %v3909_v62 = vpop.f32.mrb[2].mxu1 }
 0x178   : > { %v1707_v63 = vpop.f32.mrb[3].mxu1 }
 0x179   : > { %v3988_v0 = vpop.f32.mrb[0].mxu0 }
 0x17a   : > { %v3994_v57 = vadd.f32 %v3988_v0, %v3908_v61  ;;  %v3228_v33 = vpop.f32.mrb[1].mxu0 }
 0x17b   : > { %v3995_v1 = vadd.f32 %v3228_v33, %v1704_v60  ;;  %v3989_v2 = vpop.f32.mrb[2].mxu0 }
 0x17c   : > { %3285 = vst [vmem:[%s4727_s6 + $0x10] sm:$0xff] %v3994_v57  ;;  %v3996_v3 = vadd.f32 %v3989_v2, %v3909_v62  ;;  %v3231_v4 = vpop.f32.mrb[3].mxu0  ;;  %v3307_v8 = vmul.f32 %v3994_v57, %v3994_v57 }
 0x17d   : > { %3283 = vst [vmem:[%s4727_s6] sm:$0xff] %v3995_v1  ;;  %v3997_v5 = vadd.f32 %v3231_v4, %v1707_v63  ;;  %v3305_v17 = vmul.f32 %v3995_v1, %v3995_v1 }
 0x17e   : > { %3286 = vst [vmem:[%s4727_s6 + $0x18] sm:$0xff] %v3996_v3  ;;  %v3308_v13 = vmul.f32 %v3996_v3, %v3996_v3 }
 0x17f   : > { %3284 = vst [vmem:[%s4727_s6 + $0x8] sm:$0xff] %v3997_v5  ;;  %v3291_v6 = vadd.f32 %v3997_v5, %v3995_v1  ;;  %v3306_v7 = vmul.f32 %v3997_v5, %v3997_v5 }
 0x181   : > { %v3292_v9 = vadd.f32 %v3994_v57, %v3291_v6  ;;  %v3313_v39 = vadd.f32 %v3306_v7, %v3305_v17 }
 0x183   : > { %v3314_v10 = vadd.f32 %v3313_v39, %v3307_v8  ;;  %v3293_v11 = vadd.f32 %v3996_v3, %v3292_v9 }
 0x185   : > { %v3315_v14 = vadd.f32 %v3314_v10, %v3308_v13 }
 0x187   : > { %v3912_v15 = vpop.f32.mrb[4].mxu1 }
 0x188   : > { %v1720_v40 = vpop.f32.mrb[5].mxu1 }
 0x189   : > { %v3913_v18 = vpop.f32.mrb[6].mxu1 }
 0x18a   : > { %v1723_v20 = vpop.f32.mrb[7].mxu1 }
 0x18c   : > { %v3992_v19 = vpop.f32.mrb[4].mxu0 }
 0x18d   : > { %v3998_v21 = vadd.f32 %v3992_v19, %v3912_v15  ;;  %v3244_v22 = vpop.f32.mrb[5].mxu0 }
 0x18e   : > { %v3999_v23 = vadd.f32 %v3244_v22, %v1720_v40  ;;  %v3993_v56 = vpop.f32.mrb[6].mxu0 }
 0x18f   : > { %3289 = vst [vmem:[%s4727_s6 + $0x30] sm:$0xff] %v3998_v21  ;;  %v4000_v26 = vadd.f32 %v3993_v56, %v3913_v18  ;;  %v3247_v27 = vpop.f32.mrb[7].mxu0  ;;  %v3311_v34 = vmul.f32 %v3998_v21, %v3998_v21 }
 0x190   : > { %3287 = vst [vmem:[%s4727_s6 + $0x20] sm:$0xff] %v3999_v23  ;;  %v3294_v29 = vadd.f32 %v3999_v23, %v3293_v11  ;;  %v3309_v30 = vmul.f32 %v3999_v23, %v3999_v23  ;;  %v4001_v16 = vadd.f32 %v3247_v27, %v1723_v20 }
 0x191   : > { %3290 = vst [vmem:[%s4727_s6 + $0x38] sm:$0xff] %v4000_v26  ;;  %v3312_v36 = vmul.f32 %v4000_v26, %v4000_v26 }
 0x192   : > { %v3316_v31 = vadd.f32 %v3315_v14, %v3309_v30  ;;  %3288 = vst [vmem:[%s4727_s6 + $0x28] sm:$0xff] %v4001_v16  ;;  %v3295_v32 = vadd.f32 %v4001_v16, %v3294_v29  ;;  %v3310_v37 = vmul.f32 %v4001_v16, %v4001_v16 }
 0x194   : > { %v3296_v35 = vadd.f32 %v3998_v21, %v3295_v32  ;;  %v3317_v24 = vadd.f32 %v3316_v31, %v3310_v37 }
 0x196   : > { %v3297_v38 = vadd.f32 %v4000_v26, %v3296_v35  ;;  %v3318_v43 = vadd.f32 %v3317_v24, %v3311_v34 }
 0x198   : > { %v3298_v44 = vrot.slane %v3297_v38, 4  ;;  %v3319_v45 = vadd.f32 %v3318_v43, %v3312_v36 }
 0x19a   : > { %v3299_v46 = vadd.f32 %v3298_v44, %v3297_v38  ;;  %v3320_v47 = vrot.slane %v3319_v45, 4 }
 0x19c   : > { %v3300_v48 = vrot.slane %v3299_v46, 2  ;;  %v3321_v12 = vadd.f32 %v3320_v47, %v3319_v45 }
 0x19e   : > { %v3301_v41 = vadd.f32 %v3300_v48, %v3299_v46  ;;  %v3322_v49 = vrot.slane %v3321_v12, 2 }
 0x1a0   : > { %v3302_v42 = vrot.slane %v3301_v41, 1  ;;  %v3323_v50 = vadd.f32 %v3322_v49, %v3321_v12 }
 0x1a2   : > { %v3303_v51 = vadd.f32 %v3302_v42, %v3301_v41  ;;  %v3324_v52 = vrot.slane %v3323_v50, 1 }
 0x1a4   : > { %3304 = vst [vmem:[%s211_s9] sm:$0x1] %v3303_v51  ;;  %v3325_v53 = vadd.f32 %v3324_v52, %v3323_v50 }
 0x1a6   : > { %3326 = vst [vmem:[%s214_s12] sm:$0x1] %v3325_v53 }
 0x1a7 PF: > { %s15_s15 = sadd.s32 1, %s4177_s15  }
 0x1a8   : > { %p12_p4 = scmp.ge.s32.totalorder %s15_s15, 4  }
 0x1aa   :  { %14 = sbr.rel (!%p12_p4) target bundleno = 1 (0x1), region = 104 }

</bundles_post_ra>
